<compile_context>
chip_gen: v7x
topology: tpu7x:2x2x1
jax: 0.10.0
libtpu: 0.0.40
codegen_flags: <defaults>
</compile_context>

<pallas_src>
import functools
import math

import jax
import jax.numpy as jnp
from jax import lax
from jax.experimental import pallas as pl
from jax.experimental.pallas import tpu as pltpu

# Toy shapes consistent with the module (head_dim = n_embd / n_head = 128,
# same as the config's 1024 / 8).  B=2, T=128, C=256, H=2 heads.
B, T, C, H = 2, 128, 256, 2
NEG_INF = -1e30  # large finite mask value (exp underflows to 0 in f32)


def causal_attn_kernel(x_ref, wqkv_ref, bqkv_ref, wproj_ref, bproj_ref, o_ref,
                       qkv_scr, y_scr, *, n_head, head_dim):
    _, Tk, Ck = x_ref.shape                      # block = (1, T, C); static ints
    D = head_dim
    scale = 1.0 / math.sqrt(D)
    h = pl.program_id(1)

    # ---- fused QKV projection: once per batch element (first head step) ----
    @pl.when(h == 0)
    def _():
        xb = x_ref[0].astype(jnp.bfloat16)                           # (T, C)
        qkv = jnp.dot(xb, wqkv_ref[...],                             # bf16 MXU
                      preferred_element_type=jnp.float32)            # (T, 3C) f32
        qkv = qkv + bqkv_ref[...]                                    # (1, 3C) bcast
        # fold 1/sqrt(D) into q (in f32) before the bf16 store
        qkv_scr[:, :Ck] = (qkv[:, :Ck] * scale).astype(jnp.bfloat16)
        qkv_scr[:, Ck:] = qkv[:, Ck:].astype(jnp.bfloat16)

    # ---- per-head attention (one head per grid step) ------------------------
    q_off = pl.multiple_of(h * D, D)             # lane-aligned slices (D = 128)
    k_off = pl.multiple_of(Ck + h * D, D)
    v_off = pl.multiple_of(2 * Ck + h * D, D)
    qh = qkv_scr[:, pl.ds(q_off, D)]                                 # (T, D) bf16
    kh = qkv_scr[:, pl.ds(k_off, D)]
    vh = qkv_scr[:, pl.ds(v_off, D)]

    # scores: contract on D of both operands (no explicit transpose), f32 acc
    s = lax.dot_general(qh, kh, dimension_numbers=(((1,), (1,)), ((), ())),
                        preferred_element_type=jnp.float32)          # (T, T)
    row = lax.broadcasted_iota(jnp.int32, (Tk, Tk), 0)
    col = lax.broadcasted_iota(jnp.int32, (Tk, Tk), 1)
    s = jnp.where(row >= col, s, NEG_INF)                            # causal

    # row softmax in f32; 1/l on the EUP, folded into p@v
    m = jnp.max(s, axis=-1, keepdims=True)
    p = jnp.exp(s - m)
    l = jnp.sum(p, axis=-1, keepdims=True)
    inv_l = pl.reciprocal(l, approx=True)
    yh = jnp.dot(p.astype(jnp.bfloat16), vh,
                 preferred_element_type=jnp.float32) * inv_l         # (T, D) f32
    y_scr[:, pl.ds(q_off, D)] = yh.astype(jnp.bfloat16)

    # ---- fused output projection: once per batch element (last head step) ---
    @pl.when(h == n_head - 1)
    def _():
        out = jnp.dot(y_scr[...], wproj_ref[...],                    # (T,C)@(C,C)
                      preferred_element_type=jnp.float32) + bproj_ref[...]
        o_ref[0] = out.astype(o_ref.dtype)


def causal_self_attn(x, w_qkv, b_qkv, w_proj, b_proj, n_head):
    Bx, Tx, Cx = x.shape
    assert Cx % n_head == 0
    D = Cx // n_head

    # bf16 weight copies, made once outside the kernel (in a real model these
    # would be created at parameter init and reused across calls/layers).
    w_qkv_bf = w_qkv.astype(jnp.bfloat16)
    w_proj_bf = w_proj.astype(jnp.bfloat16)

    kernel = functools.partial(causal_attn_kernel, n_head=n_head, head_dim=D)
    return pl.pallas_call(
        kernel,
        out_shape=jax.ShapeDtypeStruct((Bx, Tx, Cx), x.dtype),
        grid_spec=pltpu.PrefetchScalarGridSpec(
            num_scalar_prefetch=0,
            grid=(Bx, n_head),
            in_specs=[
                pl.BlockSpec((1, Tx, Cx), lambda b, h: (b, 0, 0)),
                pl.BlockSpec((Cx, 3 * Cx), lambda b, h: (0, 0)),   # bf16, VMEM-resident
                pl.BlockSpec((1, 3 * Cx), lambda b, h: (0, 0)),
                pl.BlockSpec((Cx, Cx), lambda b, h: (0, 0)),       # bf16, VMEM-resident
                pl.BlockSpec((1, Cx), lambda b, h: (0, 0)),
            ],
            out_specs=pl.BlockSpec((1, Tx, Cx), lambda b, h: (b, 0, 0)),
            scratch_shapes=[
                pltpu.VMEM((Tx, 3 * Cx), jnp.bfloat16),  # fused qkv (persists over h)
                pltpu.VMEM((Tx, Cx), jnp.bfloat16),      # per-head attention outputs
            ]),
        compiler_params=pltpu.CompilerParams(
            dimension_semantics=("parallel", "arbitrary")),
    )(x, w_qkv_bf, b_qkv, w_proj_bf, b_proj)


def reference(x, w_qkv, b_qkv, w_proj, b_proj, n_head):
    """Pure-JAX f32 reference matching the PyTorch forward semantics."""
    Bx, Tx, Cx = x.shape
    D = Cx // n_head
    qkv = x @ w_qkv + b_qkv[0]
    q, k, v = jnp.split(qkv, 3, axis=-1)

    def to_heads(t):  # (B, T, C) -> (B, H, T, D)
        return t.reshape(Bx, Tx, n_head, D).transpose(0, 2, 1, 3)

    q, k, v = to_heads(q), to_heads(k), to_heads(v)
    s = jnp.einsum("bhqd,bhkd->bhqk", q, k) / math.sqrt(D)
    mask = jnp.tril(jnp.ones((Tx, Tx), dtype=bool))
    s = jnp.where(mask[None, None], s, -jnp.inf)
    p = jax.nn.softmax(s, axis=-1)
    y = jnp.einsum("bhqk,bhkd->bhqd", p, v)
    y = y.transpose(0, 2, 1, 3).reshape(Bx, Tx, Cx)
    return y @ w_proj + b_proj[0]


if __name__ == "__main__":
    key = jax.random.PRNGKey(0)
    kx, k1, k2, k3, k4 = jax.random.split(key, 5)

    # Deterministic synthetic parameters (PyTorch-Linear-like scale).
    x = jax.random.normal(kx, (B, T, C), dtype=jnp.float32)
    w_qkv = jax.random.normal(k1, (C, 3 * C), dtype=jnp.float32) * (1.0 / math.sqrt(C))
    b_qkv = jax.random.normal(k2, (1, 3 * C), dtype=jnp.float32) * 0.02
    w_proj = jax.random.normal(k3, (C, C), dtype=jnp.float32) * (1.0 / math.sqrt(C))
    b_proj = jax.random.normal(k4, (1, C), dtype=jnp.float32) * 0.02

    out = causal_self_attn(x, w_qkv, b_qkv, w_proj, b_proj, H)
    out = jax.block_until_ready(out)

    ref = reference(x, w_qkv, b_qkv, w_proj, b_proj, H)
    assert out.shape == (B, T, C)
    # bf16 MXU operands + approx reciprocal vs. f32 reference -> loose tolerance.
    assert jnp.allclose(out, ref, atol=5e-2, rtol=5e-2), \
        f"max abs err {jnp.max(jnp.abs(out - ref))}"

    print("KERNEL_OK")
</pallas_src>

<mosaic_0001>
module attributes {stable_mosaic.version = 11 : i64} {
  func.func @causal_attn_kernel(%arg0: i32, %arg1: i32, %arg2: memref<1x128x256xf32, #tpu.memory_space<vmem>>, %arg3: memref<256x768xbf16, #tpu.memory_space<vmem>>, %arg4: memref<1x768xf32, #tpu.memory_space<vmem>>, %arg5: memref<256x256xbf16, #tpu.memory_space<vmem>>, %arg6: memref<1x256xf32, #tpu.memory_space<vmem>>, %arg7: memref<1x128x256xf32, #tpu.memory_space<vmem>>, %arg8: memref<128x768xbf16, #tpu.memory_space<vmem>>, %arg9: memref<128x256xbf16, #tpu.memory_space<vmem>>) attributes {dimension_semantics = [#tpu.dimension_semantics<parallel>, #tpu.dimension_semantics<arbitrary>], iteration_bounds = array<i64: 2, 2>, scalar_prefetch = 0 : i64, scratch_operands = 2 : i64, tpu.core_type = #tpu.core_type<tc>, window_params = [{transform_indices = @transform_0, window_bounds = array<i64: 1, 128, 256>}, {pipeline_mode = #tpu.pipeline_mode<synchronous>, transform_indices = @transform_1, window_bounds = array<i64: 256, 768>}, {pipeline_mode = #tpu.pipeline_mode<synchronous>, transform_indices = @transform_2, window_bounds = array<i64: 1, 768>}, {pipeline_mode = #tpu.pipeline_mode<synchronous>, transform_indices = @transform_3, window_bounds = array<i64: 256, 256>}, {pipeline_mode = #tpu.pipeline_mode<synchronous>, transform_indices = @transform_4, window_bounds = array<i64: 1, 256>}, {transform_indices = @transform_5, window_bounds = array<i64: 1, 128, 256>}]} {
    %c0_i32 = arith.constant 0 : i32
    %0 = arith.cmpi eq, %arg1, %c0_i32 : i32
    %1 = arith.extui %0 : i1 to i32
    %c0_i32_0 = arith.constant 0 : i32
    %2 = arith.cmpi ne, %1, %c0_i32_0 : i32
    scf.if %2 {
      %c0_11 = arith.constant 0 : index
      %c0_12 = arith.constant 0 : index
      %c0_13 = arith.constant 0 : index
      %41 = vector.load %arg2[%c0_11, %c0_12, %c0_13] : memref<1x128x256xf32, #tpu.memory_space<vmem>>, vector<1x128x256xf32>
      %42 = vector.shape_cast %41 : vector<1x128x256xf32> to vector<128x256xf32>
      %43 = arith.truncf %42 : vector<128x256xf32> to vector<128x256xbf16>
      %c0_14 = arith.constant 0 : index
      %c0_15 = arith.constant 0 : index
      %44 = vector.load %arg3[%c0_14, %c0_15] : memref<256x768xbf16, #tpu.memory_space<vmem>>, vector<256x768xbf16>
      %cst_16 = arith.constant dense<0.000000e+00> : vector<128x768xf32>
      %45 = tpu.matmul %43, %44, %cst_16 {dimension_numbers = #tpu.dot_dimension_numbers<[1], [0], [0], [1], [0, 0, 1, 1], [], []>} : vector<128x256xbf16>, vector<256x768xbf16>, vector<128x768xf32> -> vector<128x768xf32>
      %c0_17 = arith.constant 0 : index
      %c0_18 = arith.constant 0 : index
      %46 = vector.load %arg4[%c0_17, %c0_18] : memref<1x768xf32, #tpu.memory_space<vmem>>, vector<1x768xf32>
      %47 = vector.broadcast %46 : vector<1x768xf32> to vector<128x768xf32>
      %48 = arith.addf %45, %47 : vector<128x768xf32>
      %49 = vector.extract_strided_slice %48 {offsets = [0, 0], sizes = [128, 256], strides = [1, 1]} : vector<128x768xf32> to vector<128x256xf32>
      %cst_19 = arith.constant 0.0883883461 : f32
      %50 = vector.broadcast %cst_19 : f32 to vector<128x256xf32>
      %51 = arith.mulf %49, %50 : vector<128x256xf32>
      %52 = arith.truncf %51 : vector<128x256xf32> to vector<128x256xbf16>
      %c0_20 = arith.constant 0 : index
      %c0_21 = arith.constant 0 : index
      %53 = vector.load %arg8[%c0_20, %c0_21] : memref<128x768xbf16, #tpu.memory_space<vmem>>, vector<128x256xbf16>
      tpu.vector_store %arg8[%c0_20, %c0_21], %52 {strides = array<i32>} : memref<128x768xbf16, #tpu.memory_space<vmem>>, vector<128x256xbf16>,
      %54 = vector.extract_strided_slice %48 {offsets = [0, 256], sizes = [128, 512], strides = [1, 1]} : vector<128x768xf32> to vector<128x512xf32>
      %55 = arith.truncf %54 : vector<128x512xf32> to vector<128x512xbf16>
      %c0_22 = arith.constant 0 : index
      %c256 = arith.constant 256 : index
      %56 = vector.load %arg8[%c0_22, %c256] : memref<128x768xbf16, #tpu.memory_space<vmem>>, vector<128x512xbf16>
      tpu.vector_store %arg8[%c0_22, %c256], %55 {strides = array<i32>} : memref<128x768xbf16, #tpu.memory_space<vmem>>, vector<128x512xbf16>,
    } else {
    }
    %c128_i32 = arith.constant 128 : i32
    %3 = arith.muli %arg1, %c128_i32 : i32
    %4 = tpu.assume_multiple %3, 128 : i32
    %c128_i32_1 = arith.constant 128 : i32
    %5 = arith.muli %arg1, %c128_i32_1 : i32
    %c256_i32 = arith.constant 256 : i32
    %6 = arith.addi %c256_i32, %5 : i32
    %7 = tpu.assume_multiple %6, 128 : i32
    %c128_i32_2 = arith.constant 128 : i32
    %8 = arith.muli %arg1, %c128_i32_2 : i32
    %c512_i32 = arith.constant 512 : i32
    %9 = arith.addi %c512_i32, %8 : i32
    %10 = tpu.assume_multiple %9, 128 : i32
    %c0 = arith.constant 0 : index
    %11 = arith.index_cast %4 : i32 to index
    %12 = vector.load %arg8[%c0, %11] : memref<128x768xbf16, #tpu.memory_space<vmem>>, vector<128x128xbf16>
    %c0_3 = arith.constant 0 : index
    %13 = arith.index_cast %7 : i32 to index
    %14 = vector.load %arg8[%c0_3, %13] : memref<128x768xbf16, #tpu.memory_space<vmem>>, vector<128x128xbf16>
    %c0_4 = arith.constant 0 : index
    %15 = arith.index_cast %10 : i32 to index
    %16 = vector.load %arg8[%c0_4, %15] : memref<128x768xbf16, #tpu.memory_space<vmem>>, vector<128x128xbf16>
    %cst = arith.constant dense<0.000000e+00> : vector<128x128xf32>
    %17 = tpu.matmul %12, %14, %cst {dimension_numbers = #tpu.dot_dimension_numbers<[1], [1], [0], [0], [0, 0, 1, 0], [], []>} : vector<128x128xbf16>, vector<128x128xbf16>, vector<128x128xf32> -> vector<128x128xf32>
    %18 = tpu.iota {dimensions = array<i32: 0>} : vector<128x128xi32>
    %19 = tpu.iota {dimensions = array<i32: 1>} : vector<128x128xi32>
    %20 = arith.cmpi sge, %18, %19 : vector<128x128xi32>
    %cst_5 = arith.constant -1.000000e+30 : f32
    %21 = vector.broadcast %cst_5 : f32 to vector<128x128xf32>
    %22 = arith.select %20, %17, %21 : vector<128x128xi1>, vector<128x128xf32>
    %cst_6 = arith.constant dense<0xFF800000> : vector<128xf32>
    %23 = vector.multi_reduction <maximumf>, %22, %cst_6 [1] : vector<128x128xf32> to vector<128xf32>
    %24 = vector.shape_cast %23 : vector<128xf32> to vector<128x1xf32>
    %25 = vector.broadcast %24 : vector<128x1xf32> to vector<128x128xf32>
    %26 = arith.subf %22, %25 : vector<128x128xf32>
    %27 = math.exp %26 : vector<128x128xf32>
    %cst_7 = arith.constant dense<0.000000e+00> : vector<128xf32>
    %28 = vector.multi_reduction <add>, %27, %cst_7 [1] : vector<128x128xf32> to vector<128xf32>
    %29 = vector.shape_cast %28 : vector<128xf32> to vector<128x1xf32>
    %30 = tpu.reciprocal %29 {approx = true} : vector<128x1xf32> -> vector<128x1xf32>
    %31 = arith.truncf %27 : vector<128x128xf32> to vector<128x128xbf16>
    %cst_8 = arith.constant dense<0.000000e+00> : vector<128x128xf32>
    %32 = tpu.matmul %31, %16, %cst_8 {dimension_numbers = #tpu.dot_dimension_numbers<[1], [0], [0], [1], [0, 0, 1, 1], [], []>} : vector<128x128xbf16>, vector<128x128xbf16>, vector<128x128xf32> -> vector<128x128xf32>
    %33 = vector.broadcast %30 : vector<128x1xf32> to vector<128x128xf32>
    %34 = arith.mulf %32, %33 : vector<128x128xf32>
    %35 = arith.truncf %34 : vector<128x128xf32> to vector<128x128xbf16>
    %c0_9 = arith.constant 0 : index
    %36 = arith.index_cast %4 : i32 to index
    %37 = vector.load %arg9[%c0_9, %36] : memref<128x256xbf16, #tpu.memory_space<vmem>>, vector<128x128xbf16>
    tpu.vector_store %arg9[%c0_9, %36], %35 {strides = array<i32>} : memref<128x256xbf16, #tpu.memory_space<vmem>>, vector<128x128xbf16>,
    %c1_i32 = arith.constant 1 : i32
    %38 = arith.cmpi eq, %arg1, %c1_i32 : i32
    %39 = arith.extui %38 : i1 to i32
    %c0_i32_10 = arith.constant 0 : i32
    %40 = arith.cmpi ne, %39, %c0_i32_10 : i32
    scf.if %40 {
      %c0_11 = arith.constant 0 : index
      %c0_12 = arith.constant 0 : index
      %41 = vector.load %arg9[%c0_11, %c0_12] : memref<128x256xbf16, #tpu.memory_space<vmem>>, vector<128x256xbf16>
      %c0_13 = arith.constant 0 : index
      %c0_14 = arith.constant 0 : index
      %42 = vector.load %arg5[%c0_13, %c0_14] : memref<256x256xbf16, #tpu.memory_space<vmem>>, vector<256x256xbf16>
      %cst_15 = arith.constant dense<0.000000e+00> : vector<128x256xf32>
      %43 = tpu.matmul %41, %42, %cst_15 {dimension_numbers = #tpu.dot_dimension_numbers<[1], [0], [0], [1], [0, 0, 1, 1], [], []>} : vector<128x256xbf16>, vector<256x256xbf16>, vector<128x256xf32> -> vector<128x256xf32>
      %c0_16 = arith.constant 0 : index
      %c0_17 = arith.constant 0 : index
      %44 = vector.load %arg6[%c0_16, %c0_17] : memref<1x256xf32, #tpu.memory_space<vmem>>, vector<1x256xf32>
      %45 = vector.broadcast %44 : vector<1x256xf32> to vector<128x256xf32>
      %46 = arith.addf %43, %45 : vector<128x256xf32>
      %c0_18 = arith.constant 0 : index
      %c0_19 = arith.constant 0 : index
      %c0_20 = arith.constant 0 : index
      %47 = vector.load %arg7[%c0_18, %c0_19, %c0_20] : memref<1x128x256xf32, #tpu.memory_space<vmem>>, vector<1x128x256xf32>
      %48 = vector.shape_cast %47 : vector<1x128x256xf32> to vector<128x256xf32>
      %49 = vector.shape_cast %46 : vector<128x256xf32> to vector<1x128x256xf32>
      tpu.vector_store %arg7[%c0_18, %c0_19, %c0_20], %49 {strides = array<i32>} : memref<1x128x256xf32, #tpu.memory_space<vmem>>, vector<1x128x256xf32>,
    } else {
    }
    return
  }
  func.func @transform_0(%arg0: i32, %arg1: i32) -> (i32, i32, i32) {
    %c0_i32 = arith.constant 0 : i32
    %c0_i32_0 = arith.constant 0 : i32
    %c0_i32_1 = arith.constant 0 : i32
    return %arg0, %c0_i32, %c0_i32_0 : i32, i32, i32
  }
  func.func @transform_1(%arg0: i32, %arg1: i32) -> (i32, i32) {
    %c0_i32 = arith.constant 0 : i32
    %c0_i32_0 = arith.constant 0 : i32
    %c0_i32_1 = arith.constant 0 : i32
    return %c0_i32, %c0_i32_0 : i32, i32
  }
  func.func @transform_2(%arg0: i32, %arg1: i32) -> (i32, i32) {
    %c0_i32 = arith.constant 0 : i32
    %c0_i32_0 = arith.constant 0 : i32
    %c0_i32_1 = arith.constant 0 : i32
    return %c0_i32, %c0_i32_0 : i32, i32
  }
  func.func @transform_3(%arg0: i32, %arg1: i32) -> (i32, i32) {
    %c0_i32 = arith.constant 0 : i32
    %c0_i32_0 = arith.constant 0 : i32
    %c0_i32_1 = arith.constant 0 : i32
    return %c0_i32, %c0_i32_0 : i32, i32
  }
  func.func @transform_4(%arg0: i32, %arg1: i32) -> (i32, i32) {
    %c0_i32 = arith.constant 0 : i32
    %c0_i32_0 = arith.constant 0 : i32
    %c0_i32_1 = arith.constant 0 : i32
    return %c0_i32, %c0_i32_0 : i32, i32
  }
  func.func @transform_5(%arg0: i32, %arg1: i32) -> (i32, i32, i32) {
    %c0_i32 = arith.constant 0 : i32
    %c0_i32_0 = arith.constant 0 : i32
    %c0_i32_1 = arith.constant 0 : i32
    return %arg0, %c0_i32, %c0_i32_0 : i32, i32, i32
  }
}

</mosaic_0001>

<bundles_post_ra>
// kernel: tpu_custom_call.1
= control target key start
LH: loop header
LB: loop body
LE: loop exit
PB: predicated region body
PF: predicated region fallthrough
CT: control target
= control target key end

     0   :  { %s3980_s0 = inlined_call_operand.hbm [shape: f32[2,128,256], index: 0, kind: input, shape index: {}]   ;;  %s3981_s1 = inlined_call_operand.hbm [shape: bf16[256,768], index: 1, kind: input, shape index: {}]   ;;  %s3982_s2 = inlined_call_operand.vmem [shape: f32[1,768], index: 2, kind: input, shape index: {}]   ;;  %s3983_s3 = inlined_call_operand.hbm [shape: bf16[256,256], index: 3, kind: input, shape index: {}]   ;;  %s3984_s4 = inlined_call_operand.vmem [shape: f32[1,256], index: 4, kind: input, shape index: {}]   ;;  %s3985_s5 = inlined_call_operand.hbm [shape: f32[2,128,256], index: 5, kind: output, shape index: {}]  }
   0x1   :  { %3992 = sst [smem:[#allocation16_spill]] %s3981_s1 }
   0x2   :  { %10 = vsyncpa [#allocation5], 0 }
   0x3   :  { %12 = vsyncpa [#allocation5 + $0x1], 0 }
   0x4   :  { %13 = vsyncpa [#allocation8], 0 }
   0x5   :  { %14 = vsyncpa [#allocation6], 0 }
   0x6   :  { %16 = vsyncpa [#allocation6 + $0x1], 0  ;;  %s3271_s18 = smov 0   ;;  %s3273_s19 = smov 0  }
   0x7   :  { %s3275_s20 = smov 0   ;;  %s3277_s21 = smov 0  }
   0x8   :  { %s3279_s22 = smov 0   ;;  %s3281_s23 = smov 0  }
   0x9   :  { %s3283_s24 = smov 0   ;;  %s3285_s25 = smov 0  }
   0xa LB: > { %3993 = sst [smem:[#allocation14_spill]] %s3199_s18  ;;  %s2360_s26 = sadd.s32 4294967295, %s3227_s25   ;;  %s3227_s25 = sphi %s3285_s25, %s22_s25   ;;  %s3223_s24 = sphi %s3283_s24, %s4018_s24   ;;  %s3219_s23 = sphi %s3281_s23, %s4017_s23   ;;  %s3215_s22 = sphi %s3279_s22, %s4016_s22   ;;  %s3211_s21 = sphi %s3277_s21, %s4015_s21   ;;  %s3207_s20 = sphi %s3275_s20, %s4014_s20   ;;  %s3203_s19 = sphi %s3273_s19, %s4013_s19   ;;  %s3199_s18 = sphi %s3271_s18, %s4012_s18  }
   0xb   : > { %s2361_s27 = sadd.s32 4294967294, %s3227_s25   ;;  %p54_p0 = scmp.ne.s32.totalorder %s3203_s19, %s3199_s18 }
   0xc   : > { %p3315_p1 = scmp.eq.s32.totalorder %s2360_s26, 0  ;;  %p3319_p2 = scmp.eq.s32.totalorder %s2360_s26, 3 }
   0xd   : > { %p168_p3 = scmp.eq.s32.totalorder %s2361_s27, 3  ;;  %p2362_p5 = scmp.ge.s32.totalorder %s3227_s25, 1 }
   0xe   : > { %s3994_s28 = scalar_select %p3315_p1, 1, 0 }
   0xf   : > { %s3995_s29 = scalar_select %p3319_p2, 1, 0 }
  0x10   : > { %p3325_p4 = por %p3315_p1, %p54_p0  ;;  %p3330_p6 = por %p168_p3, %p54_p0 }
  0x11   : > { %p175_p7 = scmp.lt.s32.totalorder %s3227_s25, 5  ;;  %s3229_s8 = smov [#allocation7]  }
  0x12   : > { %s3996_s30 = scalar_select %p3325_p4, 1, 0 }
  0x13   : > { %s3997_s6 = scalar_select %p3330_p6, 1, 0 }
  0x14   : > { %p3335_p8 = pnand %p2362_p5, %p175_p7  ;;  %s187_s9 = sshll.u32 %s3229_s8, 4  ;;  %s188_s9 = int_to_ptr.vmem [resolvable:$true] %s187_s9 }
  0x15   : > { %3998 = sst [smem:[#allocation15_spill]] %s3997_s6  ;;  %s3230_s11 = smov [#allocation9]  }
  0x16   : > { %s3999_s7 = scalar_select %p3335_p8, 1, 0 }
  0x17   : > { %p2688_p9 = pneg %p3335_p8  ;;  %s203_s12 = sshll.u32 %s3230_s11, 4  ;;  %s3347_s12 = int_to_ptr.vmem [resolvable:$true] %s203_s12 }
  0x18   : > { %s4001_s1 = sld [smem:[#allocation16_spill]] }
  0x19   : > { %p3343_p10 = pnand %p2688_p9, %p3315_p1 }
  0x1b   : > { %p3041_p12 = pneg %p3343_p10 }
  0x1e   : > { %s3039_s15 = scalar_lea.hbm %s4001_s1, 12288 }
  0x1f   : > { %p3040_p11 = scmp.ne.s32.totalorder %s4001_s1, %s3039_s15  ;;  %p3046_p3 = scmp.lt.u32.totalorder %s3039_s15, %s4001_s1 }
  0x21   : > { %p3042_p13 = pnand %p3041_p12, %p3040_p11 }
  0x23   : > { %p3043_p0 = pneg %p3042_p13 }
  0x25   : > { %p3048_p5 = pnand %p3046_p3, %p3043_p0 }
  0x27   : > { %3051 = shalt.err (!%p3048_p5)
}
  0x28   : > { %s3052_s8 = scalar_lea.vmem %s188_s9, 12288  ;;  %p3060_p1 = scmp.lt.s32.totalorder %s188_s9, %s188_s9 }
  0x29   : > { %p3053_p7 = scmp.ne.s32.totalorder %s188_s9, %s3052_s8  ;;  %p3061_p4 = scmp.lt.s32.totalorder %s3052_s8, %s3052_s8 }
  0x2b   : > { %p3055_p9 = pnand %p3053_p7, %p3041_p12  ;;  %p3062_p8 = por %p3061_p4, %p3060_p1 }
  0x2d   : > { %p3056_p6 = pneg %p3055_p9 }
  0x2f   : > { %p3063_p2 = pnand %p3062_p8, %p3056_p6 }
  0x31   : > { %3066 = shalt.err (!%p3063_p2)
}
  0x32   : > { %s3231_s11 = smov 384   ;;  %s3232_s13 = smov 24  }
  0x33   : > { %2691 = dma.hbm_to_vmem [thread:$0]  (!%p3343_p10), %s4001_s1, 12288, %s188_s9, [#allocation8], %s3231_s11, %s3231_s11, %s3232_s13  }
  0x34   : > { %s3067_s26 = scalar_lea.hbm %s3983_s3, 4096 }
  0x35   : > { %p3068_p11 = scmp.ne.s32.totalorder %s3983_s3, %s3067_s26  ;;  %p3074_p4 = scmp.lt.u32.totalorder %s3067_s26, %s3983_s3 }
  0x37   : > { %p3070_p1 = pnand %p3068_p11, %p3041_p12 }
  0x39   : > { %p3071_p2 = pneg %p3070_p1 }
  0x3b   : > { %p3076_p6 = pnand %p3074_p4, %p3071_p2 }
  0x3d   : > { %3079 = shalt.err (!%p3076_p6)
}
  0x3e   : > { %s3080_s9 = scalar_lea.vmem %s3347_s12, 4096  ;;  %p3088_p3 = scmp.lt.s32.totalorder %s3347_s12, %s3347_s12 }
  0x3f   : > { %p3081_p8 = scmp.ne.s32.totalorder %s3347_s12, %s3080_s9  ;;  %p3089_p5 = scmp.lt.s32.totalorder %s3080_s9, %s3080_s9 }
  0x41   : > { %p3083_p13 = pnand %p3081_p8, %p3041_p12  ;;  %p3090_p7 = por %p3089_p5, %p3088_p3 }
  0x43   : > { %p3084_p0 = pneg %p3083_p13 }
  0x45   : > { %p3091_p9 = pnand %p3090_p7, %p3084_p0 }
  0x47   : > { %3094 = shalt.err (!%p3091_p9)
}
  0x48   : > { %s3233_s18 = smov 128   ;;  %s3234_s6 = smov 8  }
  0x49   : > { %2694 = dma.hbm_to_vmem [thread:$0]  (!%p3343_p10), %s3983_s3, 4096, %s3347_s12, [#allocation8], %s3233_s18, %s3233_s18, %s3234_s6  }
  0x4a   : > { %s31_s14 = sadd.s32 1, %s3219_s23  ;;  %s34_s15 = sadd.s32 1, %s3223_s24 }
  0x4b   : > { %p32_p12 = scmp.ge.s32.totalorder %s31_s14, 2  ;;  %s41_s16 = sadd.s32 1, %s3207_s20 }
  0x4c   : > { %p48_p11 = scmp.ne.s32.totalorder %s3207_s20, %s3203_s19  ;;  %p49_p1 = scmp.eq.s32.totalorder %s3227_s25, 0 }
  0x4d   : > { %s4020_s14 = smov (%p32_p12, %s31_s14), 0  ;;  %s4022_s15 = smov (!%p32_p12, %s34_s15), %s3223_s24 }
  0x4e   : > { %p3405_p2 = por %p49_p1, %p48_p11  ;;  %p4003_p4 = scmp.ne.s32.totalorder %s3995_s29, 0 }
  0x4f   : > { %p36_p10 = scmp.ge.s32.totalorder %s4022_s15, 2  ;;  %p2705_p8 = scmp.lt.s32.totalorder %s3227_s25, 4 }
  0x50   : > { %p3411_p6 = por %p4003_p4, %p48_p11  ;;  %s220_s12 = sand.u32 1, %s3207_s20  }
  0x51   : > { %s2514_s26 = sshll.u32 %s3223_s24, 12  ;;  %s4024_s15 = smov (%p36_p10, %s4022_s15), 0 }
  0x52   : > { %s2366_s27 = sshll.u32 %s220_s12, 8  ;;  %s38_s8 = ssub.s32 %s3223_s24, %s4024_s15 }
  0x53   : > { %p39_p13 = scmp.eq.s32.totalorder %s38_s8, 0  ;;  %s3425_s6 = scalar_lea.hbm %s3980_s0, %s2514_s26 }
  0x54   : > { %s224_s29 = scalar_lea.vmem [#allocation4], %s2366_s27  ;;  %p3429_p0 = pnand %p2705_p8, %p3405_p2 }
  0x55   : > { %s231_s11 = sshll.u32 %s224_s29, 4  ;;  %s3438_s8 = scalar_lea.sflag [#allocation5], %s220_s12  ;;  %s3436_s11 = int_to_ptr.vmem [resolvable:$true] %s231_s11 }
  0x56   : > { %s3434_s1 = scalar_select %p39_p13, %s3207_s20, %s41_s16  }
  0x57   : > { %s3095_s26 = scalar_lea.hbm %s3425_s6, 4096  ;;  %p3097_p5 = pneg %p3429_p0 }
  0x58   : > { %p3096_p3 = scmp.ne.s32.totalorder %s3425_s6, %s3095_s26  ;;  %s3100_s9 = scalar_lea.hbm %s3980_s0, 8192 }
  0x59   : > { %p3101_p12 = scmp.lt.u32.totalorder %s3425_s6, %s3980_s0  ;;  %p3102_p11 = scmp.lt.u32.totalorder %s3100_s9, %s3095_s26 }
  0x5a   : > { %p3098_p7 = pnand %p3097_p5, %p3096_p3  ;;  %p3104_p2 = scmp.lt.u32.totalorder %s3095_s26, %s3425_s6 }
  0x5b   : > { %p3103_p1 = por %p3102_p11, %p3101_p12 }
  0x5c   : > { %p3099_p9 = pneg %p3098_p7 }
  0x5d   : > { %p3105_p4 = por %p3104_p2, %p3103_p1 }
  0x5f   : > { %p3106_p10 = pnand %p3105_p4, %p3099_p9 }
  0x61   : > { %3109 = shalt.err (!%p3106_p10)
}
  0x62   : > { %s3110_s16 = scalar_lea.vmem %s3436_s11, 4096  ;;  %s3235_s12 = smov [#allocation4]  }
  0x63   : > { %p3111_p8 = scmp.ne.s32.totalorder %s3436_s11, %s3110_s16  ;;  %s3115_s17 = sshll.u32 %s3235_s12, 4  ;;  %s3116_s17 = int_to_ptr.vmem [resolvable:$false] %s3115_s17 }
  0x64   : > { %s3117_s27 = scalar_lea.vmem %s3116_s17, 8192  ;;  %p3118_p7 = scmp.lt.s32.totalorder %s3436_s11, %s3116_s17 }
  0x65   : > { %p3113_p13 = pnand %p3111_p8, %p3097_p5  ;;  %p3119_p12 = scmp.lt.s32.totalorder %s3117_s27, %s3110_s16 }
  0x67   : > { %p3114_p3 = pneg %p3113_p13  ;;  %p3120_p11 = por %p3119_p12, %p3118_p7 }
  0x69   : > { %p3121_p1 = pnand %p3120_p11, %p3114_p3 }
  0x6b   : > { %3124 = shalt.err (!%p3121_p1)
}
  0x6c   : > { %s3236_s26 = smov 256   ;;  %s3237_s9 = smov 16  }
  0x6d   : > { %2698 = dma.hbm_to_vmem [thread:$0]  (!%p3429_p0), %s3425_s6, 4096, %s3436_s11, %s3438_s8, %s3236_s26, %s3236_s26, %s3237_s9  }
  0x6e   : > { %p4006_p5 = scmp.ne.s32.totalorder %s3999_s7, 0 }
  0x6f   : > { %s3469_s18 = sand.u32 (!%p4006_p5), 1, %s3203_s19   ;;  %p4007_p9 = scmp.ne.s32.totalorder (!%p4006_p5), %s3996_s30, 0 }
  0x70   : > { %243 = sbr.rel (%p4006_p5) target bundleno = 1492 (0x5d4), region = 40  ;;  %s2370_s29 = sshll.u32 (!%p4006_p5), %s3469_s18, 8 }
  0x71   : > { %s246_s16 = scalar_lea.sflag (!%p4006_p5), [#allocation5], %s3469_s18  ;;  %s3473_s12 = scalar_lea.vmem (!%p4006_p5), [#allocation4], %s2370_s29 }
  0x77   : > { %3186 = dma.done.wait (%p4007_p9), %s246_s16, 4096  }
  0x78   : > { %3188 = vsyncadd (%p4007_p9), %s246_s16, 4294963200  ;;  %p4008_p0 = scmp.ne.s32.totalorder %s3994_s28, 0 }
  0x7a   : > { %3190 = dma.done.wait (%p4008_p0), [#allocation8], 16384  }
  0x7b   : > { %3192 = vsyncadd (%p4008_p0), [#allocation8], 4294950912  ;;  %s3483_s7 = scalar_lea.vmem [#allocation10], %s2370_s29  ;;  %p2374_p2 = scmp.ne.s32.totalorder %s3211_s21, 0 }
  0x7c   : > { %v2783_v0 = vld [vmem:[#allocation7 + $0x4] ss:$24 sps:$4 sm:$0xff] (!%p2374_p2)   ;;  %v2787_v2 = vld [vmem:[#allocation7] ss:$24 sps:$4 sm:$0xff] (!%p2374_p2)   ;;  %v2789_v4 = vld [vmem:[#allocation7 + $0x34] ss:$24 sps:$4 sm:$0xff] (!%p2374_p2)  }
  0x7d   : > { %288 = sbr.rel (%p2374_p2) target bundleno = 498 (0x1f2), region = 56  ;;  %v2785_v1 = vld [vmem:[#allocation7 + $0xc] ss:$24 sps:$4 sm:$0xff] (!%p2374_p2)   ;;  %945 = vmatprep.subr.bf16.mxu0 (!%p2374_p2), %v2783_v0  ;;  %v2788_v3 = vld [vmem:[#allocation7 + $0x8] ss:$24 sps:$4 sm:$0xff] (!%p2374_p2)   ;;  %v292_v49 = vld [vmem:[%s3473_s12 + $0x18] sm:$0xff] (!%p2374_p2) }
  0x7e   : > { %1058 = vmatprep.subr.bf16.mxu1 (!%p2374_p2), %v2785_v1  ;;  %946 = vmatpush1.bf16.msra.mxu0 (!%p2374_p2), %v2787_v2  ;;  %v2791_v5 = vld [vmem:[#allocation7 + $0x3c] ss:$24 sps:$4 sm:$0xff] (!%p2374_p2)   ;;  %v2793_v6 = vld [vmem:[#allocation7 + $0x30] ss:$24 sps:$4 sm:$0xff] (!%p2374_p2)   ;;  %v2797_v9 = vld [vmem:[#allocation7 + $0x6c] ss:$24 sps:$4 sm:$0xff] (!%p2374_p2)  }
  0x7f   : > { %1059 = vmatpush1.bf16.msra.mxu1 (!%p2374_p2), %v2788_v3  ;;  %947 = vmatprep.subr.bf16.mxu0 (!%p2374_p2), %v2789_v4  ;;  %v2794_v7 = vld [vmem:[#allocation7 + $0x38] ss:$24 sps:$4 sm:$0xff] (!%p2374_p2)   ;;  %v2795_v8 = vld [vmem:[#allocation7 + $0x64] ss:$24 sps:$4 sm:$0xff] (!%p2374_p2)   ;;  %v2800_v11 = vld [vmem:[#allocation7 + $0x68] ss:$24 sps:$4 sm:$0xff] (!%p2374_p2)  }
  0x80   : > { %1060 = vmatprep.subr.bf16.mxu1 (!%p2374_p2), %v2791_v5  ;;  %v2799_v10 = vld [vmem:[#allocation7 + $0x60] ss:$24 sps:$4 sm:$0xff] (!%p2374_p2)   ;;  %v2801_v12 = vld [vmem:[#allocation7 + $0x94] ss:$24 sps:$4 sm:$0xff] (!%p2374_p2)   ;;  %v2805_v14 = vld [vmem:[#allocation7 + $0x90] ss:$24 sps:$4 sm:$0xff] (!%p2374_p2)  }
  0x81   : > { %v2803_v13 = vld [vmem:[#allocation7 + $0x9c] ss:$24 sps:$4 sm:$0xff] (!%p2374_p2)   ;;  %v2806_v15 = vld [vmem:[#allocation7 + $0x98] ss:$24 sps:$4 sm:$0xff] (!%p2374_p2)   ;;  %v2809_v17 = vld [vmem:[#allocation7 + $0xcc] ss:$24 sps:$4 sm:$0xff] (!%p2374_p2)  }
  0x82   : > { %948 = vmatpush1.bf16.msra.mxu0 (!%p2374_p2), %v2793_v6  ;;  %v2807_v16 = vld [vmem:[#allocation7 + $0xc4] ss:$24 sps:$4 sm:$0xff] (!%p2374_p2)   ;;  %v2811_v18 = vld [vmem:[#allocation7 + $0xc0] ss:$24 sps:$4 sm:$0xff] (!%p2374_p2)   ;;  %v2813_v20 = vld [vmem:[#allocation7 + $0xf4] ss:$24 sps:$4 sm:$0xff] (!%p2374_p2)  }
  0x83   : > { %1061 = vmatpush1.bf16.msra.mxu1 (!%p2374_p2), %v2794_v7  ;;  %949 = vmatprep.subr.bf16.mxu0 (!%p2374_p2), %v2795_v8  ;;  %v2812_v19 = vld [vmem:[#allocation7 + $0xc8] ss:$24 sps:$4 sm:$0xff] (!%p2374_p2)   ;;  %v2815_v21 = vld [vmem:[#allocation7 + $0xfc] ss:$24 sps:$4 sm:$0xff] (!%p2374_p2)   ;;  %v2818_v23 = vld [vmem:[#allocation7 + $0xf8] ss:$24 sps:$4 sm:$0xff] (!%p2374_p2)  }
  0x84   : > { %1062 = vmatprep.subr.bf16.mxu1 %v2797_v9  ;;  %v2817_v22 = vld [vmem:[#allocation7 + $0xf0] ss:$24 sps:$4 sm:$0xff]   ;;  %v2819_v24 = vld [vmem:[#allocation7 + $0x124] ss:$24 sps:$4 sm:$0xff]   ;;  %v2823_v26 = vld [vmem:[#allocation7 + $0x120] ss:$24 sps:$4 sm:$0xff]  }
  0x85   : > { %v2821_v25 = vld [vmem:[#allocation7 + $0x12c] ss:$24 sps:$4 sm:$0xff]   ;;  %v2824_v27 = vld [vmem:[#allocation7 + $0x128] ss:$24 sps:$4 sm:$0xff]   ;;  %v2827_v29 = vld [vmem:[#allocation7 + $0x15c] ss:$24 sps:$4 sm:$0xff]  }
  0x86   : > { %950 = vmatpush1.bf16.msra.mxu0 %v2799_v10  ;;  %v2825_v28 = vld [vmem:[#allocation7 + $0x154] ss:$24 sps:$4 sm:$0xff]   ;;  %v2829_v30 = vld [vmem:[#allocation7 + $0x150] ss:$24 sps:$4 sm:$0xff]   ;;  %v2831_v32 = vld [vmem:[#allocation7 + $0x184] ss:$24 sps:$4 sm:$0xff]  }
  0x87   : > { %1063 = vmatpush1.bf16.msra.mxu1 %v2800_v11  ;;  %951 = vmatprep.subr.bf16.mxu0 %v2801_v12  ;;  %v2830_v31 = vld [vmem:[#allocation7 + $0x158] ss:$24 sps:$4 sm:$0xff]   ;;  %v2833_v33 = vld [vmem:[#allocation7 + $0x18c] ss:$24 sps:$4 sm:$0xff]   ;;  %v2836_v35 = vld [vmem:[#allocation7 + $0x188] ss:$24 sps:$4 sm:$0xff]  }
  0x88   : > { %1064 = vmatprep.subr.bf16.mxu1 %v2803_v13  ;;  %v2835_v34 = vld [vmem:[#allocation7 + $0x180] ss:$24 sps:$4 sm:$0xff]   ;;  %v2837_v36 = vld [vmem:[#allocation7 + $0x1b4] ss:$24 sps:$4 sm:$0xff]   ;;  %v2841_v38 = vld [vmem:[#allocation7 + $0x1b0] ss:$24 sps:$4 sm:$0xff]  }
  0x89   : > { %v2839_v37 = vld [vmem:[#allocation7 + $0x1bc] ss:$24 sps:$4 sm:$0xff]   ;;  %v2842_v39 = vld [vmem:[#allocation7 + $0x1b8] ss:$24 sps:$4 sm:$0xff]   ;;  %v2845_v41 = vld [vmem:[#allocation7 + $0x1ec] ss:$24 sps:$4 sm:$0xff]  }
  0x8a   : > { %952 = vmatpush1.bf16.msra.mxu0 %v2805_v14  ;;  %v2843_v40 = vld [vmem:[#allocation7 + $0x1e4] ss:$24 sps:$4 sm:$0xff]   ;;  %v2847_v42 = vld [vmem:[#allocation7 + $0x1e0] ss:$24 sps:$4 sm:$0xff]   ;;  %v2849_v44 = vld [vmem:[#allocation7 + $0x214] ss:$24 sps:$4 sm:$0xff]  }
  0x8b   : > { %1065 = vmatpush1.bf16.msra.mxu1 %v2806_v15  ;;  %953 = vmatprep.subr.bf16.mxu0 %v2807_v16  ;;  %v2848_v43 = vld [vmem:[#allocation7 + $0x1e8] ss:$24 sps:$4 sm:$0xff]   ;;  %v2851_v45 = vld [vmem:[#allocation7 + $0x21c] ss:$24 sps:$4 sm:$0xff]   ;;  %v2854_v48 = vld [vmem:[#allocation7 + $0x218] ss:$24 sps:$4 sm:$0xff]  }
  0x8c   : > { %1066 = vmatprep.subr.bf16.mxu1 %v2809_v17  ;;  %v290_v46 = vld [vmem:[%s3473_s12 + $0x8] sm:$0xff]  ;;  %v2855_v50 = vld [vmem:[#allocation7 + $0x244] ss:$24 sps:$4 sm:$0xff]   ;;  %v2859_v53 = vld [vmem:[#allocation7 + $0x240] ss:$24 sps:$4 sm:$0xff]  }
  0x8d   : > { %v2853_v47 = vld [vmem:[#allocation7 + $0x210] ss:$24 sps:$4 sm:$0xff]   ;;  %v3488_v51 = vpack.c.bf16 %v292_v49, %v290_v46  ;;  %v2857_v52 = vld [vmem:[#allocation7 + $0x24c] ss:$24 sps:$4 sm:$0xff]   ;;  %v2863_v56 = vld [vmem:[#allocation7 + $0x27c] ss:$24 sps:$4 sm:$0xff]  }
  0x8e   : > { %954 = vmatpush1.bf16.msra.mxu0 %v2811_v18  ;;  %v2860_v54 = vld [vmem:[#allocation7 + $0x248] ss:$24 sps:$4 sm:$0xff]   ;;  %v2861_v55 = vld [vmem:[#allocation7 + $0x274] ss:$24 sps:$4 sm:$0xff]   ;;  %v2866_v58 = vld [vmem:[#allocation7 + $0x278] ss:$24 sps:$4 sm:$0xff]  }
  0x8f   : > { %1067 = vmatpush1.bf16.msra.mxu1 %v2812_v19  ;;  %955 = vmatprep.subr.bf16.mxu0 %v2813_v20  ;;  %v2865_v57 = vld [vmem:[#allocation7 + $0x270] ss:$24 sps:$4 sm:$0xff]   ;;  %v2867_v59 = vld [vmem:[#allocation7 + $0x2a4] ss:$24 sps:$4 sm:$0xff]   ;;  %v2871_v61 = vld [vmem:[#allocation7 + $0x2a0] ss:$24 sps:$4 sm:$0xff]  }
  0x90   : > { %1068 = vmatprep.subr.bf16.mxu1 %v2815_v21  ;;  %977 = vmatprep.mubr.bf16.mxu0 %v3488_v51  ;;  %v2869_v60 = vld [vmem:[#allocation7 + $0x2ac] ss:$24 sps:$4 sm:$0xff]   ;;  %v2872_v62 = vld [vmem:[#allocation7 + $0x2a8] ss:$24 sps:$4 sm:$0xff]   ;;  %v2875_v0 = vld [vmem:[#allocation7 + $0x2dc] ss:$24 sps:$4 sm:$0xff]  }
  0x91   : > { %1090 = vmatprep.mubr.bf16.mxu1 %v3488_v51  ;;  %v2873_v63 = vld [vmem:[#allocation7 + $0x2d4] ss:$24 sps:$4 sm:$0xff]   ;;  %v2877_v1 = vld [vmem:[#allocation7 + $0x2d0] ss:$24 sps:$4 sm:$0xff]   ;;  %v289_v3 = vld [vmem:[%s3473_s12] sm:$0xff] }
  0x92   : > { %956 = vmatpush1.bf16.msra.mxu0 %v2817_v22  ;;  %v2878_v2 = vld [vmem:[#allocation7 + $0x2d8] ss:$24 sps:$4 sm:$0xff]   ;;  %v2881_v5 = vld [vmem:[#allocation7 + $0x14] ss:$24 sps:$4 sm:$0xff]   ;;  %v2884_v10 = vld [vmem:[#allocation7 + $0x44] ss:$24 sps:$4 sm:$0xff]  }
  0x93   : > { %1069 = vmatpush1.bf16.msra.mxu1 %v2818_v23  ;;  %957 = vmatprep.subr.bf16.mxu0 %v2819_v24  ;;  %v291_v4 = vld [vmem:[%s3473_s12 + $0x10] sm:$0xff]  ;;  %v294_v7 = vld [vmem:[%s3473_s12 + $0x28] sm:$0xff]  ;;  %v296_v8 = vld [vmem:[%s3473_s12 + $0x38] sm:$0xff] }
  0x94   : > { %1070 = vmatprep.subr.bf16.mxu1 %v2821_v25  ;;  %v3494_v6 = vpack.c.bf16 %v291_v4, %v289_v3  ;;  %v2879_v9 = vld [vmem:[#allocation7 + $0x10] ss:$24 sps:$4 sm:$0xff]   ;;  %v3498_v11 = vpack.c.bf16 %v296_v8, %v294_v7  ;;  %v2882_v12 = vld [vmem:[#allocation7 + $0x40] ss:$24 sps:$4 sm:$0xff]   ;;  %v2887_v15 = vld [vmem:[#allocation7 + $0x74] ss:$24 sps:$4 sm:$0xff]  }
  0x95   : > { %v293_v13 = vld [vmem:[%s3473_s12 + $0x20] sm:$0xff]  ;;  %v295_v14 = vld [vmem:[%s3473_s12 + $0x30] sm:$0xff]  ;;  %v298_v17 = vld [vmem:[%s3473_s12 + $0x48] sm:$0xff] }
  0x96   : > { %958 = vmatpush1.bf16.msra.mxu0 %v2823_v26  ;;  %v3506_v16 = vpack.c.bf16 %v295_v14, %v293_v13  ;;  %v300_v18 = vld [vmem:[%s3473_s12 + $0x58] sm:$0xff]  ;;  %v2885_v19 = vld [vmem:[#allocation7 + $0x70] ss:$24 sps:$4 sm:$0xff]   ;;  %v297_v23 = vld [vmem:[%s3473_s12 + $0x40] sm:$0xff] }
  0x97   : > { %1071 = vmatpush1.bf16.msra.mxu1 %v2824_v27  ;;  %959 = vmatprep.subr.bf16.mxu0 %v2825_v28  ;;  %v2890_v20 = vld [vmem:[#allocation7 + $0xa4] ss:$24 sps:$4 sm:$0xff]   ;;  %v3510_v21 = vpack.c.bf16 %v300_v18, %v298_v17  ;;  %v2888_v22 = vld [vmem:[#allocation7 + $0xa0] ss:$24 sps:$4 sm:$0xff]   ;;  %v299_v24 = vld [vmem:[%s3473_s12 + $0x50] sm:$0xff] }
  0x98   : > { %1072 = vmatprep.subr.bf16.mxu1 %v2827_v29  ;;  %v2893_v25 = vld [vmem:[#allocation7 + $0xd4] ss:$24 sps:$4 sm:$0xff]   ;;  %v3518_v26 = vpack.c.bf16 %v299_v24, %v297_v23  ;;  %v304_v28 = vld [vmem:[%s3473_s12 + $0x78] sm:$0xff]  ;;  %v2891_v29 = vld [vmem:[#allocation7 + $0xd0] ss:$24 sps:$4 sm:$0xff]  }
  0x99   : > { %v302_v27 = vld [vmem:[%s3473_s12 + $0x68] sm:$0xff]  ;;  %v2920_v8 = vld [vmem:[#allocation7 + $0x284] ss:$24 sps:$4 sm:$0xff]   ;;  %v319_v13 = vld [vmem:[%s3473_s12 + $0xf0] sm:$0xff] }
  0x9a   : > { %960 = vmatpush1.bf16.msra.mxu0 %v2829_v30  ;;  %v2896_v30 = vld [vmem:[#allocation7 + $0x104] ss:$24 sps:$4 sm:$0xff]   ;;  %v2903_v49 = vld [vmem:[#allocation7 + $0x190] ss:$24 sps:$4 sm:$0xff]   ;;  %v2923_v14 = vld [vmem:[#allocation7 + $0x2b4] ss:$24 sps:$4 sm:$0xff]  }
  0x9b   : > { %1073 = vmatpush1.bf16.msra.mxu1 %v2830_v31  ;;  %961 = vmatprep.subr.bf16.mxu0 %v2831_v32  ;;  %v3522_v31 = vpack.c.bf16 %v304_v28, %v302_v27  ;;  %v2894_v32 = vld [vmem:[#allocation7 + $0x100] ss:$24 sps:$4 sm:$0xff]   ;;  %v318_v4 = vld [vmem:[%s3473_s12 + $0xe8] sm:$0xff]  ;;  %v2926_v18 = vld [vmem:[#allocation7 + $0x2e4] ss:$24 sps:$4 sm:$0xff]  }
  0x9c   : > { %1074 = vmatprep.subr.bf16.mxu1 %v2833_v33  ;;  %v301_v33 = vld [vmem:[%s3473_s12 + $0x60] sm:$0xff]  ;;  %v2915_v7 = vld [vmem:[#allocation7 + $0x250] ss:$24 sps:$4 sm:$0xff]  }
  0x9d   : > { %v2921_v17 = vld [vmem:[#allocation7 + $0x2b0] ss:$24 sps:$4 sm:$0xff]  }
  0x9e   : > { %962 = vmatpush1.bf16.msra.mxu0 %v2835_v34  ;;  %v303_v34 = vld [vmem:[%s3473_s12 + $0x70] sm:$0xff] }
  0x9f   : > { %1075 = vmatpush1.bf16.msra.mxu1 %v2836_v35  ;;  %963 = vmatprep.subr.bf16.mxu0 %v2837_v36  ;;  %v2899_v35 = vld [vmem:[#allocation7 + $0x134] ss:$24 sps:$4 sm:$0xff]   ;;  %v3530_v36 = vpack.c.bf16 %v303_v34, %v301_v33 }
  0xa0   : > { %1076 = vmatprep.subr.bf16.mxu1 %v2839_v37  ;;  %v306_v37 = vld [vmem:[%s3473_s12 + $0x88] sm:$0xff] }
  0xa2   : > { %964 = vmatpush1.bf16.msra.mxu0 %v2841_v38  ;;  %v308_v38 = vld [vmem:[%s3473_s12 + $0x98] sm:$0xff] }
  0xa3   : > { %1077 = vmatpush1.bf16.msra.mxu1 %v2842_v39  ;;  %965 = vmatprep.subr.bf16.mxu0 %v2843_v40  ;;  %v2897_v39 = vld [vmem:[#allocation7 + $0x130] ss:$24 sps:$4 sm:$0xff]   ;;  %v2902_v40 = vld [vmem:[#allocation7 + $0x164] ss:$24 sps:$4 sm:$0xff]  }
  0xa4   : > { %1078 = vmatprep.subr.bf16.mxu1 %v2845_v41  ;;  %v3534_v41 = vpack.c.bf16 %v308_v38, %v306_v37 }
  0xa6   : > { %966 = vmatpush1.bf16.msra.mxu0 %v2847_v42  ;;  %v2900_v42 = vld [vmem:[#allocation7 + $0x160] ss:$24 sps:$4 sm:$0xff]  }
  0xa7   : > { %1079 = vmatpush1.bf16.msra.mxu1 %v2848_v43  ;;  %967 = vmatprep.subr.bf16.mxu0 %v2849_v44  ;;  %v305_v43 = vld [vmem:[%s3473_s12 + $0x80] sm:$0xff]  ;;  %v307_v44 = vld [vmem:[%s3473_s12 + $0x90] sm:$0xff] }
  0xa8   : > { %1080 = vmatprep.subr.bf16.mxu1 %v2851_v45  ;;  %v2905_v45 = vld [vmem:[#allocation7 + $0x194] ss:$24 sps:$4 sm:$0xff]   ;;  %v3542_v46 = vpack.c.bf16 %v307_v44, %v305_v43 }
  0xaa   : > { %968 = vmatpush1.bf16.msra.mxu0 %v2853_v47  ;;  %v310_v47 = vld [vmem:[%s3473_s12 + $0xa8] sm:$0xff] }
  0xab   : > { %1081 = vmatpush1.bf16.msra.mxu1 %v2854_v48  ;;  %969 = vmatprep.subr.bf16.mxu0 %v2855_v50  ;;  %v312_v48 = vld [vmem:[%s3473_s12 + $0xb8] sm:$0xff] }
  0xac   : > { %1082 = vmatprep.subr.bf16.mxu1 %v2857_v52  ;;  %v2908_v50 = vld [vmem:[#allocation7 + $0x1c4] ss:$24 sps:$4 sm:$0xff]   ;;  %v3546_v52 = vpack.c.bf16 %v312_v48, %v310_v47 }
  0xae   : > { %970 = vmatpush1.bf16.msra.mxu0 %v2859_v53  ;;  %v2906_v53 = vld [vmem:[#allocation7 + $0x1c0] ss:$24 sps:$4 sm:$0xff]  }
  0xaf   : > { %1083 = vmatpush1.bf16.msra.mxu1 %v2860_v54  ;;  %971 = vmatprep.subr.bf16.mxu0 %v2861_v55  ;;  %v309_v54 = vld [vmem:[%s3473_s12 + $0xa0] sm:$0xff]  ;;  %v311_v55 = vld [vmem:[%s3473_s12 + $0xb0] sm:$0xff] }
  0xb0   : > { %1084 = vmatprep.subr.bf16.mxu1 %v2863_v56  ;;  %v2911_v56 = vld [vmem:[#allocation7 + $0x1f4] ss:$24 sps:$4 sm:$0xff]  }
  0xb2   : > { %972 = vmatpush1.bf16.msra.mxu0 %v2865_v57  ;;  %v3554_v57 = vpack.c.bf16 %v311_v55, %v309_v54 }
  0xb3   : > { %1085 = vmatpush1.bf16.msra.mxu1 %v2866_v58  ;;  %973 = vmatprep.subr.bf16.mxu0 %v2867_v59  ;;  %v314_v58 = vld [vmem:[%s3473_s12 + $0xc8] sm:$0xff]  ;;  %v316_v59 = vld [vmem:[%s3473_s12 + $0xd8] sm:$0xff] }
  0xb4   : > { %1086 = vmatprep.subr.bf16.mxu1 %v2869_v60  ;;  %v2909_v60 = vld [vmem:[#allocation7 + $0x1f0] ss:$24 sps:$4 sm:$0xff]  }
  0xb6   : > { %974 = vmatpush1.bf16.msra.mxu0 %v2871_v61  ;;  %v2914_v61 = vld [vmem:[#allocation7 + $0x224] ss:$24 sps:$4 sm:$0xff]  }
  0xb7   : > { %1087 = vmatpush1.bf16.msra.mxu1 %v2872_v62  ;;  %975 = vmatprep.subr.bf16.mxu0 %v2873_v63  ;;  %v334_v62 = vpack.c.bf16 %v316_v59, %v314_v58  ;;  %v2912_v63 = vld [vmem:[#allocation7 + $0x220] ss:$24 sps:$4 sm:$0xff]  }
  0xb8   : > { %1088 = vmatprep.subr.bf16.mxu1 %v2875_v0  ;;  %v313_v0 = vld [vmem:[%s3473_s12 + $0xc0] sm:$0xff] }
  0xba   : > { %976 = vmatpush1.bf16.msra.mxu0 %v2877_v1  ;;  %v315_v1 = vld [vmem:[%s3473_s12 + $0xd0] sm:$0xff] }
  0xbb   : > { %1089 = vmatpush1.bf16.msra.mxu1 %v2878_v2  ;;  %1171 = vmatprep.subr.bf16.mxu0 %v2881_v5  ;;  %v2917_v2 = vld [vmem:[#allocation7 + $0x254] ss:$24 sps:$4 sm:$0xff]   ;;  %v333_v3 = vpack.c.bf16 %v315_v1, %v313_v0 }
  0xbc   : > { %2612 = vmatprep.subr.bf16.mxu1 %v2881_v5  ;;  %v320_v5 = vld [vmem:[%s3473_s12 + $0xf8] sm:$0xff] }
  0xbd   : > { %978 = vmatmul.mubr.bf16.vlgmr.msra.gmra.mrb[0].mxu0 %v3494_v6 }
  0xbe   : > { %1091 = vmatmul.mubr.bf16.vlgmr.msra.gmra.mrb[0].mxu1 %v3494_v6  ;;  %1172 = vmatpush1.bf16.msra.mxu0 %v2879_v9 }
  0xbf   : > { %2628 = vmatpush1.bf16.msra.mxu1 %v2879_v9  ;;  %1173 = vmatprep.subr.bf16.mxu0 %v2884_v10  ;;  %v336_v9 = vpack.c.bf16 %v320_v5, %v318_v4 }
  0xc0   : > { %2613 = vmatprep.subr.bf16.mxu1 %v2884_v10  ;;  %987 = vmatprep.mubr.bf16.mxu0 %v3498_v11  ;;  %v2918_v10 = vld [vmem:[#allocation7 + $0x280] ss:$24 sps:$4 sm:$0xff]  }
  0xc1   : > { %1100 = vmatprep.mubr.bf16.mxu1 %v3498_v11 }
  0xc2   : > { %1174 = vmatpush1.bf16.msra.mxu0 %v2882_v12 }
  0xc3   : > { %2629 = vmatpush1.bf16.msra.mxu1 %v2882_v12  ;;  %1175 = vmatprep.subr.bf16.mxu0 %v2887_v15  ;;  %v317_v12 = vld [vmem:[%s3473_s12 + $0xe0] sm:$0xff] }
  0xc4   : > { %2614 = vmatprep.subr.bf16.mxu1 %v2887_v15  ;;  %v335_v15 = vpack.c.bf16 %v319_v13, %v317_v12 }
  0xc5   : > { %988 = vmatmul.mubr.bf16.gmra.mrb[4].mxu0 %v3506_v16 }
  0xc6   : > { %1101 = vmatmul.mubr.bf16.gmra.mrb[4].mxu1 %v3506_v16  ;;  %1176 = vmatpush1.bf16.msra.mxu0 %v2885_v19 }
  0xc7   : > { %2630 = vmatpush1.bf16.msra.mxu1 %v2885_v19  ;;  %1177 = vmatprep.subr.bf16.mxu0 %v2890_v20  ;;  %v2924_v19 = vld [vmem:[#allocation7 + $0x2e0] ss:$24 sps:$4 sm:$0xff]  }
  0xc8   : > { %2615 = vmatprep.subr.bf16.mxu1 %v2890_v20  ;;  %997 = vmatprep.mubr.bf16.mxu0 %v3510_v21 }
  0xc9   : > { %1110 = vmatprep.mubr.bf16.mxu1 %v3510_v21 }
  0xca   : > { %1178 = vmatpush1.bf16.msra.mxu0 %v2888_v22 }
  0xcb   : > { %2631 = vmatpush1.bf16.msra.mxu1 %v2888_v22  ;;  %1179 = vmatprep.subr.bf16.mxu0 %v2893_v25 }
  0xcc   : > { %2616 = vmatprep.subr.bf16.mxu1 %v2893_v25 }
  0xcd   : > { %998 = vmatmul.mubr.bf16.gmra.mrb[8].mxu0 %v3518_v26 }
  0xce   : > { %1111 = vmatmul.mubr.bf16.gmra.mrb[8].mxu1 %v3518_v26  ;;  %1180 = vmatpush1.bf16.msra.mxu0 %v2891_v29 }
  0xcf   : > { %2632 = vmatpush1.bf16.msra.mxu1 %v2891_v29  ;;  %1181 = vmatprep.subr.bf16.mxu0 %v2896_v30 }
  0xd0   : > { %2617 = vmatprep.subr.bf16.mxu1 %v2896_v30  ;;  %1007 = vmatprep.mubr.bf16.mxu0 %v3522_v31 }
  0xd1   : > { %1120 = vmatprep.mubr.bf16.mxu1 %v3522_v31 }
  0xd2   : > { %1182 = vmatpush1.bf16.msra.mxu0 %v2894_v32 }
  0xd3   : > { %2633 = vmatpush1.bf16.msra.mxu1 %v2894_v32  ;;  %1183 = vmatprep.subr.bf16.mxu0 %v2899_v35 }
  0xd4   : > { %2618 = vmatprep.subr.bf16.mxu1 %v2899_v35 }
  0xd5   : > { %1008 = vmatmul.mubr.bf16.gmra.mrb[12].mxu0 %v3530_v36 }
  0xd6   : > { %1121 = vmatmul.mubr.bf16.gmra.mrb[12].mxu1 %v3530_v36  ;;  %1184 = vmatpush1.bf16.msra.mxu0 %v2897_v39 }
  0xd7   : > { %2634 = vmatpush1.bf16.msra.mxu1 %v2897_v39  ;;  %1185 = vmatprep.subr.bf16.mxu0 %v2902_v40 }
  0xd8   : > { %2619 = vmatprep.subr.bf16.mxu1 %v2902_v40  ;;  %1017 = vmatprep.mubr.bf16.mxu0 %v3534_v41 }
  0xd9   : > { %1130 = vmatprep.mubr.bf16.mxu1 %v3534_v41 }
  0xda   : > { %1186 = vmatpush1.bf16.msra.mxu0 %v2900_v42 }
  0xdb   : > { %2635 = vmatpush1.bf16.msra.mxu1 %v2900_v42  ;;  %1187 = vmatprep.subr.bf16.mxu0 %v2905_v45 }
  0xdc   : > { %2620 = vmatprep.subr.bf16.mxu1 %v2905_v45 }
  0xdd   : > { %1018 = vmatmul.mubr.bf16.gmra.mrb[16].mxu0 %v3542_v46 }
  0xde   : > { %1131 = vmatmul.mubr.bf16.gmra.mrb[16].mxu1 %v3542_v46  ;;  %1188 = vmatpush1.bf16.msra.mxu0 %v2903_v49 }
  0xdf   : > { %2636 = vmatpush1.bf16.msra.mxu1 %v2903_v49  ;;  %1189 = vmatprep.subr.bf16.mxu0 %v2908_v50 }
  0xe0   : > { %2621 = vmatprep.subr.bf16.mxu1 %v2908_v50  ;;  %1027 = vmatprep.mubr.bf16.mxu0 %v3546_v52 }
  0xe1   : > { %1140 = vmatprep.mubr.bf16.mxu1 %v3546_v52 }
  0xe2   : > { %1190 = vmatpush1.bf16.msra.mxu0 %v2906_v53 }
  0xe3   : > { %2637 = vmatpush1.bf16.msra.mxu1 %v2906_v53  ;;  %1191 = vmatprep.subr.bf16.mxu0 %v2911_v56 }
  0xe4   : > { %2622 = vmatprep.subr.bf16.mxu1 %v2911_v56 }
  0xe5   : > { %1028 = vmatmul.mubr.bf16.gmra.mrb[20].mxu0 %v3554_v57 }
  0xe6   : > { %1141 = vmatmul.mubr.bf16.gmra.mrb[20].mxu1 %v3554_v57  ;;  %1192 = vmatpush1.bf16.msra.mxu0 %v2909_v60 }
  0xe7   : > { %2638 = vmatpush1.bf16.msra.mxu1 %v2909_v60  ;;  %1193 = vmatprep.subr.bf16.mxu0 %v2914_v61 }
  0xe8   : > { %2623 = vmatprep.subr.bf16.mxu1 %v2914_v61  ;;  %1037 = vmatprep.mubr.bf16.mxu0 %v334_v62 }
  0xe9   : > { %1150 = vmatprep.mubr.bf16.mxu1 %v334_v62 }
  0xea   : > { %1194 = vmatpush1.bf16.msra.mxu0 %v2912_v63 }
  0xeb   : > { %2639 = vmatpush1.bf16.msra.mxu1 %v2912_v63  ;;  %1195 = vmatprep.subr.bf16.mxu0 %v2917_v2 }
  0xec   : > { %2624 = vmatprep.subr.bf16.mxu1 %v2917_v2 }
  0xed   : > { %1038 = vmatmul.mubr.bf16.gmra.mrb[24].mxu0 %v333_v3 }
  0xee   : > { %1151 = vmatmul.mubr.bf16.gmra.mrb[24].mxu1 %v333_v3  ;;  %1196 = vmatpush1.bf16.msra.mxu0 %v2915_v7 }
  0xef   : > { %2640 = vmatpush1.bf16.msra.mxu1 %v2915_v7  ;;  %1197 = vmatprep.subr.bf16.mxu0 %v2920_v8 }
  0xf0   : > { %2625 = vmatprep.subr.bf16.mxu1 %v2920_v8  ;;  %1047 = vmatprep.mubr.bf16.mxu0 %v336_v9 }
  0xf1   : > { %1160 = vmatprep.mubr.bf16.mxu1 %v336_v9 }
  0xf2   : > { %1198 = vmatpush1.bf16.msra.mxu0 %v2918_v10 }
  0xf3   : > { %2641 = vmatpush1.bf16.msra.mxu1 %v2918_v10  ;;  %1199 = vmatprep.subr.bf16.mxu0 %v2923_v14 }
  0xf4   : > { %2626 = vmatprep.subr.bf16.mxu1 %v2923_v14 }
  0xf5   : > { %1048 = vmatmul.mubr.bf16.gmra.mrb[28].mxu0 %v335_v15 }
  0xf6   : > { %1161 = vmatmul.mubr.bf16.gmra.mrb[28].mxu1 %v335_v15  ;;  %1200 = vmatpush1.bf16.msra.mxu0 %v2921_v17 }
  0xf7   : > { %2642 = vmatpush1.bf16.msra.mxu1 %v2921_v17  ;;  %1201 = vmatprep.subr.bf16.mxu0 %v2926_v18 }
  0xf8   : > { %2627 = vmatprep.subr.bf16.mxu1 %v2926_v18  ;;  %1203 = vmatprep.mubr.bf16.mxu0 %v3488_v51  ;;  %v435_v51 = vlaneseq }
  0xf9   : > { %1243 = vmatprep.mubr.bf16.mxu1 %v3534_v41 }
  0xfa   : > { %1202 = vmatpush1.bf16.msra.mxu0 %v2924_v19 }
  0xfb   : > { %2643 = vmatpush1.bf16.msra.mxu1 %v2924_v19 }
  0xfd   : > { %1204 = vmatmul.mubr.bf16.vlgmr.msra.gmra.mrb[32].mxu0 %v3494_v6  ;;  %v3578_v6 = vshrl.u32 %v435_v51, 7 }
  0xfe   : > { %1244 = vmatmul.mubr.bf16.vlgmr.msra.gmra.mrb[32].mxu1 %v3542_v46  ;;  %1213 = vmatprep.mubr.bf16.mxu0 %v3498_v11 }
  0xff   : > { %1253 = vmatprep.mubr.bf16.mxu1 %v3546_v52  ;;  %v437_v11 = vsub.s32 0, %v3578_v6  ;;  %v441_v20 = vsub.s32 1, %v3578_v6  ;;  %v449_v22 = vsub.s32 3, %v3578_v6 }
 0x105   : > { %1214 = vmatmul.mubr.bf16.gmra.mrb[36].mxu0 %v3506_v16  ;;  %v3584_v16 = vld [vmem:[%s3982_s2] sm:$0x3f] }
 0x106   : > { %1254 = vmatmul.mubr.bf16.gmra.mrb[36].mxu1 %v3554_v57  ;;  %1223 = vmatprep.mubr.bf16.mxu0 %v3510_v21  ;;  %v445_v21 = vsub.s32 2, %v3578_v6  ;;  %v3590_v23 = vrot.slane %v3584_v16, %v437_v11  ;;  %v3593_v24 = vrot.slane %v3584_v16, %v441_v20  ;;  %v3599_v28 = vrot.slane %v3584_v16, %v449_v22 }
 0x107   : > { %1263 = vmatprep.mubr.bf16.mxu1 %v334_v62 }
 0x108   : > { %v3596_v25 = vrot.slane %v3584_v16, %v445_v21 }
 0x10d   : > { %1224 = vmatmul.mubr.bf16.gmra.mrb[40].mxu0 %v3518_v26 }
 0x10e   : > { %1264 = vmatmul.mubr.bf16.gmra.mrb[40].mxu1 %v333_v3  ;;  %1233 = vmatprep.mubr.bf16.mxu0 %v3522_v31 }
 0x10f   : > { %1273 = vmatprep.mubr.bf16.mxu1 %v336_v9 }
 0x115   : > { %1234 = vmatmul.mubr.bf16.gmra.mrb[44].mxu0 %v3530_v36 }
 0x116   : > { %1274 = vmatmul.mubr.bf16.gmra.mrb[44].mxu1 %v335_v15 }
 0x190   : > { %v979_v26 = vpop.f32.mrb[0].mxu0 }
 0x191   : > { %v1092_v27 = vpop.f32.mrb[0].mxu1  ;;  %v980_v29 = vadd.f32 %v979_v26, %v3590_v23  ;;  %v981_v30 = vpop.f32.mrb[1].mxu0 }
 0x192   : > { %v1094_v31 = vpop.f32.mrb[1].mxu1  ;;  %v982_v32 = vadd.f32 %v981_v30, %v3593_v24  ;;  %v983_v33 = vpop.f32.mrb[2].mxu0  ;;  %v1093_v35 = vadd.f32 %v1092_v27, %v3596_v25 }
 0x193   : > { %v1096_v34 = vpop.f32.mrb[2].mxu1  ;;  %v984_v36 = vadd.f32 %v983_v33, %v3590_v23  ;;  %v985_v38 = vpop.f32.mrb[3].mxu0  ;;  %v1095_v40 = vadd.f32 %v1094_v31, %v3599_v28  ;;  %v1284_v43 = vmul.f32 0.088388346, %v980_v29 }
 0x194   : > { %v1097_v37 = vadd.f32 %v1096_v34, %v3596_v25  ;;  %v1098_v39 = vpop.f32.mrb[3].mxu1  ;;  %v986_v41 = vadd.f32 %v985_v38, %v3593_v24  ;;  %v1285_v46 = vmul.f32 0.088388346, %v982_v32 }
 0x195   : > { %v1099_v42 = vadd.f32 %v1098_v39, %v3599_v28  ;;  %v1286_v44 = vmul.f32 0.088388346, %v984_v36 }
 0x196   : > { %v1348_v45 = vpack.c.bf16 %v1097_v37, %v1093_v35  ;;  %v1287_v47 = vmul.f32 0.088388346, %v986_v41 }
 0x197   : > { %v1349_v48 = vpack.c.bf16 %v1099_v42, %v1095_v40  ;;  %v1316_v49 = vpack.c.bf16 %v1286_v44, %v1284_v43 }
 0x198   : > { %1380 = vst [vmem:[#allocation2 + $0x10] sm:$0xff] %v1348_v45  ;;  %v1317_v50 = vpack.c.bf16 %v1287_v47, %v1285_v46  ;;  %v989_v52 = vpop.f32.mrb[4].mxu0 }
 0x199   : > { %1381 = vst [vmem:[#allocation2 + $0x18] sm:$0xff] %v1349_v48  ;;  %v1102_v53 = vpop.f32.mrb[4].mxu1  ;;  %1332 = vst [vmem:[#allocation2] sm:$0xff] %v1316_v49  ;;  %v990_v54 = vadd.f32 %v989_v52, %v3590_v23  ;;  %v991_v55 = vpop.f32.mrb[5].mxu0 }
 0x19a   : > { %v1104_v56 = vpop.f32.mrb[5].mxu1  ;;  %1333 = vst [vmem:[#allocation2 + $0x8] sm:$0xff] %v1317_v50  ;;  %v992_v57 = vadd.f32 %v991_v55, %v3593_v24  ;;  %v993_v58 = vpop.f32.mrb[6].mxu0  ;;  %v1103_v60 = vadd.f32 %v1102_v53, %v3596_v25 }
 0x19b   : > { %v1106_v59 = vpop.f32.mrb[6].mxu1  ;;  %v994_v61 = vadd.f32 %v993_v58, %v3590_v23  ;;  %v995_v63 = vpop.f32.mrb[7].mxu0  ;;  %v1105_v1 = vadd.f32 %v1104_v56, %v3599_v28  ;;  %v1288_v4 = vmul.f32 0.088388346, %v990_v54 }
 0x19c   : > { %v1107_v62 = vadd.f32 %v1106_v59, %v3596_v25  ;;  %v1108_v0 = vpop.f32.mrb[7].mxu1  ;;  %v996_v2 = vadd.f32 %v995_v63, %v3593_v24  ;;  %v1289_v8 = vmul.f32 0.088388346, %v992_v57 }
 0x19d   : > { %v1109_v3 = vadd.f32 %v1108_v0, %v3599_v28  ;;  %v1290_v5 = vmul.f32 0.088388346, %v994_v61 }
 0x19e   : > { %v1352_v7 = vpack.c.bf16 %v1107_v62, %v1103_v60  ;;  %v1291_v9 = vmul.f32 0.088388346, %v996_v2 }
 0x19f   : > { %v1353_v10 = vpack.c.bf16 %v1109_v3, %v1105_v1  ;;  %v1318_v12 = vpack.c.bf16 %v1290_v5, %v1288_v4 }
 0x1a0   : > { %1384 = vst [vmem:[#allocation2 + $0x40] sm:$0xff] %v1352_v7  ;;  %v1319_v13 = vpack.c.bf16 %v1291_v9, %v1289_v8  ;;  %v999_v14 = vpop.f32.mrb[8].mxu0 }
 0x1a1   : > { %1385 = vst [vmem:[#allocation2 + $0x48] sm:$0xff] %v1353_v10  ;;  %v1112_v15 = vpop.f32.mrb[8].mxu1  ;;  %1334 = vst [vmem:[#allocation2 + $0x30] sm:$0xff] %v1318_v12  ;;  %v1000_v17 = vadd.f32 %v999_v14, %v3590_v23  ;;  %v1001_v18 = vpop.f32.mrb[9].mxu0 }
 0x1a2   : > { %v1114_v19 = vpop.f32.mrb[9].mxu1  ;;  %1335 = vst [vmem:[#allocation2 + $0x38] sm:$0xff] %v1319_v13  ;;  %v1002_v51 = vadd.f32 %v1001_v18, %v3593_v24  ;;  %v1003_v11 = vpop.f32.mrb[10].mxu0  ;;  %v1113_v21 = vadd.f32 %v1112_v15, %v3596_v25 }
 0x1a3   : > { %v1116_v20 = vpop.f32.mrb[10].mxu1  ;;  %v1004_v22 = vadd.f32 %v1003_v11, %v3590_v23  ;;  %v1005_v27 = vpop.f32.mrb[11].mxu0  ;;  %v1115_v30 = vadd.f32 %v1114_v19, %v3599_v28  ;;  %v1292_v33 = vmul.f32 0.088388346, %v1000_v17 }
 0x1a4   : > { %v1117_v26 = vadd.f32 %v1116_v20, %v3596_v25  ;;  %v1118_v29 = vpop.f32.mrb[11].mxu1  ;;  %v1006_v31 = vadd.f32 %v1005_v27, %v3593_v24  ;;  %v1293_v36 = vmul.f32 0.088388346, %v1002_v51 }
 0x1a5   : > { %v1119_v32 = vadd.f32 %v1118_v29, %v3599_v28  ;;  %v1294_v34 = vmul.f32 0.088388346, %v1004_v22 }
 0x1a6   : > { %v1356_v35 = vpack.c.bf16 %v1117_v26, %v1113_v21  ;;  %v1295_v37 = vmul.f32 0.088388346, %v1006_v31 }
 0x1a7   : > { %v1357_v38 = vpack.c.bf16 %v1119_v32, %v1115_v30  ;;  %v1320_v39 = vpack.c.bf16 %v1294_v34, %v1292_v33 }
 0x1a8   : > { %1388 = vst [vmem:[#allocation2 + $0x70] sm:$0xff] %v1356_v35  ;;  %v1321_v40 = vpack.c.bf16 %v1295_v37, %v1293_v36  ;;  %v1009_v41 = vpop.f32.mrb[12].mxu0 }
 0x1a9   : > { %1389 = vst [vmem:[#allocation2 + $0x78] sm:$0xff] %v1357_v38  ;;  %v1122_v42 = vpop.f32.mrb[12].mxu1  ;;  %1336 = vst [vmem:[#allocation2 + $0x60] sm:$0xff] %v1320_v39  ;;  %v1010_v43 = vadd.f32 %v1009_v41, %v3590_v23  ;;  %v1011_v44 = vpop.f32.mrb[13].mxu0 }
 0x1aa   : > { %v1124_v45 = vpop.f32.mrb[13].mxu1  ;;  %1337 = vst [vmem:[#allocation2 + $0x68] sm:$0xff] %v1321_v40  ;;  %v1012_v46 = vadd.f32 %v1011_v44, %v3593_v24  ;;  %v1013_v47 = vpop.f32.mrb[14].mxu0  ;;  %v1123_v49 = vadd.f32 %v1122_v42, %v3596_v25 }
 0x1ab   : > { %v1126_v48 = vpop.f32.mrb[14].mxu1  ;;  %v1014_v50 = vadd.f32 %v1013_v47, %v3590_v23  ;;  %v1015_v53 = vpop.f32.mrb[15].mxu0  ;;  %v1125_v55 = vadd.f32 %v1124_v45, %v3599_v28  ;;  %v1296_v58 = vmul.f32 0.088388346, %v1010_v43 }
 0x1ac   : > { %v1127_v52 = vadd.f32 %v1126_v48, %v3596_v25  ;;  %v1128_v54 = vpop.f32.mrb[15].mxu1  ;;  %v1016_v56 = vadd.f32 %v1015_v53, %v3593_v24  ;;  %v1297_v61 = vmul.f32 0.088388346, %v1012_v46 }
 0x1ad   : > { %v1129_v57 = vadd.f32 %v1128_v54, %v3599_v28  ;;  %v1298_v59 = vmul.f32 0.088388346, %v1014_v50 }
 0x1ae   : > { %v1360_v60 = vpack.c.bf16 %v1127_v52, %v1123_v49  ;;  %v1299_v62 = vmul.f32 0.088388346, %v1016_v56 }
 0x1af   : > { %v1361_v63 = vpack.c.bf16 %v1129_v57, %v1125_v55  ;;  %v1322_v0 = vpack.c.bf16 %v1298_v59, %v1296_v58 }
 0x1b0   : > { %1392 = vst [vmem:[#allocation2 + $0xa0] sm:$0xff] %v1360_v60  ;;  %v1323_v1 = vpack.c.bf16 %v1299_v62, %v1297_v61  ;;  %v1019_v2 = vpop.f32.mrb[16].mxu0 }
 0x1b1   : > { %1393 = vst [vmem:[#allocation2 + $0xa8] sm:$0xff] %v1361_v63  ;;  %v1132_v3 = vpop.f32.mrb[16].mxu1  ;;  %1338 = vst [vmem:[#allocation2 + $0x90] sm:$0xff] %v1322_v0  ;;  %v1020_v4 = vadd.f32 %v1019_v2, %v3590_v23  ;;  %v1021_v5 = vpop.f32.mrb[17].mxu0 }
 0x1b2   : > { %v1134_v7 = vpop.f32.mrb[17].mxu1  ;;  %1339 = vst [vmem:[#allocation2 + $0x98] sm:$0xff] %v1323_v1  ;;  %v1022_v8 = vadd.f32 %v1021_v5, %v3593_v24  ;;  %v1023_v9 = vpop.f32.mrb[18].mxu0  ;;  %v1133_v12 = vadd.f32 %v1132_v3, %v3596_v25 }
 0x1b3   : > { %v1136_v10 = vpop.f32.mrb[18].mxu1  ;;  %v1024_v13 = vadd.f32 %v1023_v9, %v3590_v23  ;;  %v1025_v15 = vpop.f32.mrb[19].mxu0  ;;  %v1135_v18 = vadd.f32 %v1134_v7, %v3599_v28  ;;  %v1300_v11 = vmul.f32 0.088388346, %v1020_v4 }
 0x1b4   : > { %v1137_v14 = vadd.f32 %v1136_v10, %v3596_v25  ;;  %v1138_v17 = vpop.f32.mrb[19].mxu1  ;;  %v1026_v19 = vadd.f32 %v1025_v15, %v3593_v24  ;;  %v1301_v22 = vmul.f32 0.088388346, %v1022_v8 }
 0x1b5   : > { %v1139_v51 = vadd.f32 %v1138_v17, %v3599_v28  ;;  %v1302_v20 = vmul.f32 0.088388346, %v1024_v13 }
 0x1b6   : > { %v1364_v21 = vpack.c.bf16 %v1137_v14, %v1133_v12  ;;  %v1303_v26 = vmul.f32 0.088388346, %v1026_v19 }
 0x1b7   : > { %v1365_v27 = vpack.c.bf16 %v1139_v51, %v1135_v18  ;;  %v1324_v29 = vpack.c.bf16 %v1302_v20, %v1300_v11 }
 0x1b8   : > { %1396 = vst [vmem:[#allocation2 + $0xd0] sm:$0xff] %v1364_v21  ;;  %v1325_v30 = vpack.c.bf16 %v1303_v26, %v1301_v22  ;;  %v1029_v31 = vpop.f32.mrb[20].mxu0 }
 0x1b9   : > { %1397 = vst [vmem:[#allocation2 + $0xd8] sm:$0xff] %v1365_v27  ;;  %v1142_v32 = vpop.f32.mrb[20].mxu1  ;;  %1340 = vst [vmem:[#allocation2 + $0xc0] sm:$0xff] %v1324_v29  ;;  %v1030_v33 = vadd.f32 %v1029_v31, %v3590_v23  ;;  %v1031_v34 = vpop.f32.mrb[21].mxu0 }
 0x1ba   : > { %v1144_v35 = vpop.f32.mrb[21].mxu1  ;;  %1341 = vst [vmem:[#allocation2 + $0xc8] sm:$0xff] %v1325_v30  ;;  %v1032_v36 = vadd.f32 %v1031_v34, %v3593_v24  ;;  %v1033_v37 = vpop.f32.mrb[22].mxu0  ;;  %v1143_v39 = vadd.f32 %v1142_v32, %v3596_v25  ;;  %v453_v34 = vsub.s32 4, %v3578_v6 }
 0x1bb   : > { %v1146_v38 = vpop.f32.mrb[22].mxu1  ;;  %v1034_v40 = vadd.f32 %v1033_v37, %v3590_v23  ;;  %v1035_v42 = vpop.f32.mrb[23].mxu0  ;;  %v1145_v44 = vadd.f32 %v1144_v35, %v3599_v28  ;;  %v1304_v47 = vmul.f32 0.088388346, %v1030_v33 }
 0x1bc   : > { %v1147_v41 = vadd.f32 %v1146_v38, %v3596_v25  ;;  %v1148_v43 = vpop.f32.mrb[23].mxu1  ;;  %v1036_v45 = vadd.f32 %v1035_v42, %v3593_v24  ;;  %v1305_v50 = vmul.f32 0.088388346, %v1032_v36  ;;  %v457_v38 = vsub.s32 5, %v3578_v6 }
 0x1bd   : > { %v1149_v46 = vadd.f32 %v1148_v43, %v3599_v28  ;;  %v1306_v48 = vmul.f32 0.088388346, %v1034_v40 }
 0x1be   : > { %v1368_v49 = vpack.c.bf16 %v1147_v41, %v1143_v39  ;;  %v1307_v52 = vmul.f32 0.088388346, %v1036_v45 }
 0x1bf   : > { %v1369_v53 = vpack.c.bf16 %v1149_v46, %v1145_v44  ;;  %v1326_v54 = vpack.c.bf16 %v1306_v48, %v1304_v47 }
 0x1c0   : > { %1400 = vst [vmem:[#allocation2 + $0x100] sm:$0xff] %v1368_v49  ;;  %v1327_v55 = vpack.c.bf16 %v1307_v52, %v1305_v50  ;;  %v1039_v56 = vpop.f32.mrb[24].mxu0 }
 0x1c1   : > { %1401 = vst [vmem:[#allocation2 + $0x108] sm:$0xff] %v1369_v53  ;;  %v1152_v57 = vpop.f32.mrb[24].mxu1  ;;  %1342 = vst [vmem:[#allocation2 + $0xf0] sm:$0xff] %v1326_v54  ;;  %v1040_v58 = vadd.f32 %v1039_v56, %v3590_v23  ;;  %v1041_v59 = vpop.f32.mrb[25].mxu0 }
 0x1c2   : > { %v1154_v60 = vpop.f32.mrb[25].mxu1  ;;  %1343 = vst [vmem:[#allocation2 + $0xf8] sm:$0xff] %v1327_v55  ;;  %v1042_v61 = vadd.f32 %v1041_v59, %v3593_v24  ;;  %v1043_v62 = vpop.f32.mrb[26].mxu0  ;;  %v1153_v0 = vadd.f32 %v1152_v57, %v3596_v25 }
 0x1c3   : > { %v1156_v63 = vpop.f32.mrb[26].mxu1  ;;  %v1044_v1 = vadd.f32 %v1043_v62, %v3590_v23  ;;  %v1045_v3 = vpop.f32.mrb[27].mxu0  ;;  %v1155_v5 = vadd.f32 %v1154_v60, %v3599_v28  ;;  %v1308_v9 = vmul.f32 0.088388346, %v1040_v58 }
 0x1c4   : > { %v1157_v2 = vadd.f32 %v1156_v63, %v3596_v25  ;;  %v1158_v4 = vpop.f32.mrb[27].mxu1  ;;  %v1046_v7 = vadd.f32 %v1045_v3, %v3593_v24  ;;  %v1309_v13 = vmul.f32 0.088388346, %v1042_v61 }
 0x1c5   : > { %v1159_v8 = vadd.f32 %v1158_v4, %v3599_v28  ;;  %v1310_v10 = vmul.f32 0.088388346, %v1044_v1 }
 0x1c6   : > { %v1372_v12 = vpack.c.bf16 %v1157_v2, %v1153_v0  ;;  %v1311_v14 = vmul.f32 0.088388346, %v1046_v7 }
 0x1c7   : > { %v1373_v15 = vpack.c.bf16 %v1159_v8, %v1155_v5  ;;  %v1328_v17 = vpack.c.bf16 %v1310_v10, %v1308_v9 }
 0x1c8   : > { %1404 = vst [vmem:[#allocation2 + $0x130] sm:$0xff] %v1372_v12  ;;  %v1329_v18 = vpack.c.bf16 %v1311_v14, %v1309_v13  ;;  %v1049_v19 = vpop.f32.mrb[28].mxu0 }
 0x1c9   : > { %1405 = vst [vmem:[#allocation2 + $0x138] sm:$0xff] %v1373_v15  ;;  %v1162_v51 = vpop.f32.mrb[28].mxu1  ;;  %1344 = vst [vmem:[#allocation2 + $0x120] sm:$0xff] %v1328_v17  ;;  %v1050_v11 = vadd.f32 %v1049_v19, %v3590_v23  ;;  %v1051_v20 = vpop.f32.mrb[29].mxu0 }
 0x1ca   : > { %v1164_v21 = vpop.f32.mrb[29].mxu1  ;;  %1345 = vst [vmem:[#allocation2 + $0x128] sm:$0xff] %v1329_v18  ;;  %v1052_v22 = vadd.f32 %v1051_v20, %v3593_v24  ;;  %v1053_v26 = vpop.f32.mrb[30].mxu0  ;;  %v1163_v29 = vadd.f32 %v1162_v51, %v3596_v25 }
 0x1cb   : > { %v1166_v27 = vpop.f32.mrb[30].mxu1  ;;  %v1054_v30 = vadd.f32 %v1053_v26, %v3590_v23  ;;  %v1055_v32 = vpop.f32.mrb[31].mxu0  ;;  %v1165_v35 = vadd.f32 %v1164_v21, %v3599_v28  ;;  %v1312_v39 = vmul.f32 0.088388346, %v1050_v11 }
 0x1cc   : > { %v1167_v31 = vadd.f32 %v1166_v27, %v3596_v25  ;;  %v1168_v33 = vpop.f32.mrb[31].mxu1  ;;  %v1056_v36 = vadd.f32 %v1055_v32, %v3593_v24  ;;  %v1313_v42 = vmul.f32 0.088388346, %v1052_v22  ;;  %v3668_v25 = vrot.slane %v3584_v16, %v453_v34 }
 0x1cd   : > { %v1169_v37 = vadd.f32 %v1168_v33, %v3599_v28  ;;  %v1314_v40 = vmul.f32 0.088388346, %v1054_v30  ;;  %v3671_v24 = vrot.slane %v3584_v16, %v457_v38 }
 0x1ce   : > { %v1376_v41 = vpack.c.bf16 %v1167_v31, %v1163_v29  ;;  %v1315_v43 = vmul.f32 0.088388346, %v1056_v36 }
 0x1cf   : > { %v1377_v23 = vpack.c.bf16 %v1169_v37, %v1165_v35  ;;  %v1330_v44 = vpack.c.bf16 %v1314_v40, %v1312_v39 }
 0x1d0   : > { %1408 = vst [vmem:[#allocation2 + $0x160] sm:$0xff] %v1376_v41  ;;  %v1331_v45 = vpack.c.bf16 %v1315_v43, %v1313_v42  ;;  %v1205_v46 = vpop.f32.mrb[32].mxu0 }
 0x1d1   : > { %1409 = vst [vmem:[#allocation2 + $0x168] sm:$0xff] %v1377_v23  ;;  %v1245_v47 = vpop.f32.mrb[32].mxu1  ;;  %1346 = vst [vmem:[#allocation2 + $0x150] sm:$0xff] %v1330_v44  ;;  %v1207_v6 = vpop.f32.mrb[33].mxu0  ;;  %v1206_v50 = vadd.f32 %v1205_v46, %v3668_v25 }
 0x1d2   : > { %v1247_v28 = vpop.f32.mrb[33].mxu1  ;;  %1347 = vst [vmem:[#allocation2 + $0x158] sm:$0xff] %v1331_v45  ;;  %v1209_v48 = vpop.f32.mrb[34].mxu0  ;;  %v1246_v52 = vadd.f32 %v1245_v47, %v3668_v25  ;;  %v1208_v57 = vadd.f32 %v1207_v6, %v3671_v24 }
 0x1d3   : > { %v1249_v49 = vpop.f32.mrb[34].mxu1  ;;  %v1210_v53 = vadd.f32 %v1209_v48, %v3668_v25  ;;  %v1211_v55 = vpop.f32.mrb[35].mxu0  ;;  %v1248_v16 = vadd.f32 %v1247_v28, %v3671_v24 }
 0x1d4   : > { %v1250_v54 = vadd.f32 %v1249_v49, %v3668_v25  ;;  %v1251_v56 = vpop.f32.mrb[35].mxu1  ;;  %v1212_v58 = vadd.f32 %v1211_v55, %v3671_v24 }
 0x1d5   : > { %v1252_v59 = vadd.f32 %v1251_v56, %v3671_v24  ;;  %v1350_v60 = vpack.c.bf16 %v1210_v53, %v1206_v50 }
 0x1d6   : > { %v1366_v61 = vpack.c.bf16 %v1250_v54, %v1246_v52  ;;  %v1351_v62 = vpack.c.bf16 %v1212_v58, %v1208_v57 }
 0x1d7   : > { %v1367_v63 = vpack.c.bf16 %v1252_v59, %v1248_v16  ;;  %1382 = vst [vmem:[#allocation2 + $0x20] sm:$0xff] %v1350_v60 }
 0x1d8   : > { %1398 = vst [vmem:[#allocation2 + $0xe0] sm:$0xff] %v1366_v61  ;;  %1383 = vst [vmem:[#allocation2 + $0x28] sm:$0xff] %v1351_v62  ;;  %v1215_v0 = vpop.f32.mrb[36].mxu0 }
 0x1d9   : > { %1399 = vst [vmem:[#allocation2 + $0xe8] sm:$0xff] %v1367_v63  ;;  %v1255_v1 = vpop.f32.mrb[36].mxu1  ;;  %v1217_v2 = vpop.f32.mrb[37].mxu0  ;;  %v1216_v7 = vadd.f32 %v1215_v0, %v3668_v25 }
 0x1da   : > { %v1257_v3 = vpop.f32.mrb[37].mxu1  ;;  %v1219_v4 = vpop.f32.mrb[38].mxu0  ;;  %v1256_v8 = vadd.f32 %v1255_v1, %v3668_v25  ;;  %v1218_v14 = vadd.f32 %v1217_v2, %v3671_v24 }
 0x1db   : > { %v1259_v5 = vpop.f32.mrb[38].mxu1  ;;  %v1220_v9 = vadd.f32 %v1219_v4, %v3668_v25  ;;  %v1221_v12 = vpop.f32.mrb[39].mxu0  ;;  %v1258_v15 = vadd.f32 %v1257_v3, %v3671_v24 }
 0x1dc   : > { %v1260_v10 = vadd.f32 %v1259_v5, %v3668_v25  ;;  %v1261_v13 = vpop.f32.mrb[39].mxu1  ;;  %v1222_v17 = vadd.f32 %v1221_v12, %v3671_v24 }
 0x1dd   : > { %v1262_v18 = vadd.f32 %v1261_v13, %v3671_v24  ;;  %v1354_v19 = vpack.c.bf16 %v1220_v9, %v1216_v7 }
 0x1de   : > { %v1370_v51 = vpack.c.bf16 %v1260_v10, %v1256_v8  ;;  %v1355_v11 = vpack.c.bf16 %v1222_v17, %v1218_v14 }
 0x1df   : > { %v1371_v20 = vpack.c.bf16 %v1262_v18, %v1258_v15  ;;  %1386 = vst [vmem:[#allocation2 + $0x50] sm:$0xff] %v1354_v19 }
 0x1e0   : > { %1402 = vst [vmem:[#allocation2 + $0x110] sm:$0xff] %v1370_v51  ;;  %1387 = vst [vmem:[#allocation2 + $0x58] sm:$0xff] %v1355_v11  ;;  %v1225_v21 = vpop.f32.mrb[40].mxu0 }
 0x1e1   : > { %1403 = vst [vmem:[#allocation2 + $0x118] sm:$0xff] %v1371_v20  ;;  %v1265_v22 = vpop.f32.mrb[40].mxu1  ;;  %v1227_v26 = vpop.f32.mrb[41].mxu0  ;;  %v1226_v31 = vadd.f32 %v1225_v21, %v3668_v25 }
 0x1e2   : > { %v1267_v27 = vpop.f32.mrb[41].mxu1  ;;  %v1229_v29 = vpop.f32.mrb[42].mxu0  ;;  %v1266_v32 = vadd.f32 %v1265_v22, %v3668_v25  ;;  %v1228_v37 = vadd.f32 %v1227_v26, %v3671_v24 }
 0x1e3   : > { %v1269_v30 = vpop.f32.mrb[42].mxu1  ;;  %v1230_v33 = vadd.f32 %v1229_v29, %v3668_v25  ;;  %v1231_v35 = vpop.f32.mrb[43].mxu0  ;;  %v1268_v38 = vadd.f32 %v1267_v27, %v3671_v24 }
 0x1e4   : > { %v1270_v34 = vadd.f32 %v1269_v30, %v3668_v25  ;;  %v1271_v36 = vpop.f32.mrb[43].mxu1  ;;  %v1232_v39 = vadd.f32 %v1231_v35, %v3671_v24 }
 0x1e5   : > { %v1272_v40 = vadd.f32 %v1271_v36, %v3671_v24  ;;  %v1358_v41 = vpack.c.bf16 %v1230_v33, %v1226_v31 }
 0x1e6   : > { %v1374_v42 = vpack.c.bf16 %v1270_v34, %v1266_v32  ;;  %v1359_v43 = vpack.c.bf16 %v1232_v39, %v1228_v37 }
 0x1e7   : > { %v1375_v23 = vpack.c.bf16 %v1272_v40, %v1268_v38  ;;  %1390 = vst [vmem:[#allocation2 + $0x80] sm:$0xff] %v1358_v41 }
 0x1e8   : > { %1406 = vst [vmem:[#allocation2 + $0x140] sm:$0xff] %v1374_v42  ;;  %1391 = vst [vmem:[#allocation2 + $0x88] sm:$0xff] %v1359_v43  ;;  %v1235_v44 = vpop.f32.mrb[44].mxu0 }
 0x1e9   : > { %1407 = vst [vmem:[#allocation2 + $0x148] sm:$0xff] %v1375_v23  ;;  %v1275_v45 = vpop.f32.mrb[44].mxu1  ;;  %v1237_v46 = vpop.f32.mrb[45].mxu0  ;;  %v1236_v48 = vadd.f32 %v1235_v44, %v3668_v25 }
 0x1ea   : > { %v1277_v47 = vpop.f32.mrb[45].mxu1  ;;  %v1239_v6 = vpop.f32.mrb[46].mxu0  ;;  %v1276_v49 = vadd.f32 %v1275_v45, %v3668_v25  ;;  %v1238_v55 = vadd.f32 %v1237_v46, %v3671_v24 }
 0x1eb   : > { %v1279_v28 = vpop.f32.mrb[46].mxu1  ;;  %v1240_v50 = vadd.f32 %v1239_v6, %v3668_v25  ;;  %v1241_v53 = vpop.f32.mrb[47].mxu0  ;;  %v1278_v56 = vadd.f32 %v1277_v47, %v3671_v24 }
 0x1ec   : > { %v1280_v52 = vadd.f32 %v1279_v28, %v3668_v25  ;;  %v1281_v54 = vpop.f32.mrb[47].mxu1  ;;  %v1242_v57 = vadd.f32 %v1241_v53, %v3671_v24 }
 0x1ed   : > { %v1282_v16 = vadd.f32 %v1281_v54, %v3671_v24  ;;  %v1362_v58 = vpack.c.bf16 %v1240_v50, %v1236_v48 }
 0x1ee   : > { %v1378_v59 = vpack.c.bf16 %v1280_v52, %v1276_v49  ;;  %v1363_v60 = vpack.c.bf16 %v1242_v57, %v1238_v55 }
 0x1ef   : > { %v1379_v61 = vpack.c.bf16 %v1282_v16, %v1278_v56  ;;  %1394 = vst [vmem:[#allocation2 + $0xb0] sm:$0xff] %v1362_v58 }
 0x1f0   : > { %1410 = vst [vmem:[#allocation2 + $0x170] sm:$0xff] %v1378_v59  ;;  %1395 = vst [vmem:[#allocation2 + $0xb8] sm:$0xff] %v1363_v60 }
 0x1f1   : > { %1411 = vst [vmem:[#allocation2 + $0x178] sm:$0xff] %v1379_v61 }
 0x1f2 PF: > { %s3706_s6 = sshll.u32 %s3211_s21, 7  ;;  %v1548_v18 = vlaneseq  ;;  %p2476_p4 = scmp.ne.s32.totalorder %s3211_s21, 1 }
 0x1f3   : > { %s1413_s11 = sadd.s32 256, %s3706_s6  ;;  %s1415_s13 = sshra.s32 %s3706_s6, 7 }
 0x1f4   : > { %s1427_s8 = sshra.s32 %s1413_s11, 7  ;;  %s3710_s17 = sshll.u32 %s1415_s13, 3  ;;  %v3729_v19 = vshrl.u32 %v1548_v18, 7  ;;  %v3732_v11 = vand.u32 127, %v1548_v18 }
 0x1f5   : > { %s2473_s27 = sshll.u32 %s1427_s8, 3  ;;  %s3713_s26 = scalar_lea.vmem [#allocation2], %s3710_s17 }
 0x1f6   : > { %s1430_s9 = scalar_lea.vmem [#allocation2], %s2473_s27  ;;  %s1414_s29 = sadd.s32 512, %s3706_s6  ;;  %v1551_v51 = vadd.s32 16, %v3729_v19  ;;  %v1552_v20 = vadd.s32 24, %v3729_v19  ;;  %vm1567_vm1 = vcmp.ge.s32.totalorder %v3729_v19, %v3732_v11  ;;  %v1550_v21 = vadd.s32 8, %v3729_v19 }
 0x1f7   : > { %s1439_s16 = sshra.s32 %s1414_s29, 7  ;;  %v1553_v32 = vadd.s32 32, %v3729_v19  ;;  %v1554_v34 = vadd.s32 40, %v3729_v19  ;;  %v1555_v36 = vadd.s32 48, %v3729_v19  ;;  %v1556_v39 = vadd.s32 56, %v3729_v19  ;;  %s3835_s30 = scalar_lea.vmem [#allocation3], %s3710_s17 }
 0x1f8   : > { %v1419_v25 = vld [vmem:[%s3713_s26] sm:$0xff]  ;;  %v1432_v62 = vld [vmem:[%s1430_s9 + $0x30] sm:$0xff]  ;;  %s2474_s12 = sshll.u32 %s1439_s16, 3  ;;  %vm1569_vm0 = vcmp.ge.s32.totalorder %v1551_v51, %v3732_v11  ;;  %vm1570_vm2 = vcmp.ge.s32.totalorder %v1552_v20, %v3732_v11  ;;  %vm1568_vm3 = vcmp.ge.s32.totalorder %v1550_v21, %v3732_v11  ;;  %v1557_v43 = vadd.s32 64, %v3729_v19 }
 0x1f9   : > { %v1431_v24 = vld [vmem:[%s1430_s9] sm:$0xff]  ;;  %2564 = vmatprep.mubr.bf16.mxu0 %v1419_v25  ;;  %v1434_v0 = vld [vmem:[%s1430_s9 + $0x90] sm:$0xff]  ;;  %s3724_s28 = scalar_lea.vmem [#allocation2], %s2474_s12  ;;  %vm1571_vm4 = vcmp.ge.s32.totalorder %v1553_v32, %v3732_v11  ;;  %vm1572_vm5 = vcmp.ge.s32.totalorder %v1554_v34, %v3732_v11  ;;  %vm1573_vm6 = vcmp.ge.s32.totalorder %v1555_v36, %v3732_v11  ;;  %vm1574_vm7 = vcmp.ge.s32.totalorder %v1556_v39, %v3732_v11 }
 0x1fa   : > { %2548 = vmatprep.subr.bf16.mxu0 %v1431_v24  ;;  %v1433_v63 = vld [vmem:[%s1430_s9 + $0x60] sm:$0xff]  ;;  %v1436_v2 = vld [vmem:[%s1430_s9 + $0xf0] sm:$0xff]  ;;  %v1558_v44 = vadd.s32 72, %v3729_v19  ;;  %vm1575_vm8 = vcmp.ge.s32.totalorder %v1557_v43, %v3732_v11  ;;  %v1559_v46 = vadd.s32 80, %v3729_v19  ;;  %v1560_v48 = vadd.s32 88, %v3729_v19 }
 0x1fb   : > { %2549 = vmatpush3.bf16.xpose.msra.mxu0 %v1431_v24  ;;  %v1435_v1 = vld [vmem:[%s1430_s9 + $0xc0] sm:$0xff]  ;;  %v1438_v4 = vld [vmem:[%s1430_s9 + $0x150] sm:$0xff]  ;;  %v1561_v54 = vadd.s32 96, %v3729_v19  ;;  %v1562_v56 = vadd.s32 104, %v3729_v19  ;;  %v1563_v58 = vadd.s32 112, %v3729_v19  ;;  %v1564_v25 = vadd.s32 120, %v3729_v19 }
 0x1fc   : > { %2550 = vmatprep.subr.bf16.mxu0 %v1432_v62  ;;  %v1437_v3 = vld [vmem:[%s1430_s9 + $0x120] sm:$0xff]  ;;  %v1420_v5 = vld [vmem:[%s3713_s26 + $0x30] sm:$0xff]  ;;  %vm1576_vm9 = vcmp.ge.s32.totalorder %v1558_v44, %v3732_v11  ;;  %vm1577_vm10 = vcmp.ge.s32.totalorder %v1559_v46, %v3732_v11  ;;  %vm1578_vm11 = vcmp.ge.s32.totalorder %v1560_v48, %v3732_v11 }
 0x1fd   : > { %v1421_v7 = vld [vmem:[%s3713_s26 + $0x60] sm:$0xff]  ;;  %v1422_v8 = vld [vmem:[%s3713_s26 + $0x90] sm:$0xff]  ;;  %vm1579_vm12 = vcmp.ge.s32.totalorder %v1561_v54, %v3732_v11  ;;  %vm1580_vm13 = vcmp.ge.s32.totalorder %v1562_v56, %v3732_v11  ;;  %vm1581_vm14 = vcmp.ge.s32.totalorder %v1563_v58, %v3732_v11  ;;  %vm1582_vm15 = vcmp.ge.s32.totalorder %v1564_v25, %v3732_v11 }
 0x1fe   : > { %v1423_v9 = vld [vmem:[%s3713_s26 + $0xc0] sm:$0xff]  ;;  %v1424_v10 = vld [vmem:[%s3713_s26 + $0xf0] sm:$0xff] }
 0x1ff   : > { %v1425_v12 = vld [vmem:[%s3713_s26 + $0x120] sm:$0xff]  ;;  %v1426_v13 = vld [vmem:[%s3713_s26 + $0x150] sm:$0xff] }
 0x200   : > { %v1443_v14 = vld [vmem:[%s3724_s28] sm:$0xff]  ;;  %v1444_v15 = vld [vmem:[%s3724_s28 + $0x30] sm:$0xff] }
 0x201   : > { %2580 = vmatprep.subr.bf16.mxu1 %v1443_v14  ;;  %v1445_v17 = vld [vmem:[%s3724_s28 + $0x60] sm:$0xff]  ;;  %v1446_v52 = vld [vmem:[%s3724_s28 + $0x90] sm:$0xff] }
 0x202   : > { %2581 = vmatpush3.bf16.msra.mxu1 %v1443_v14  ;;  %v1447_v16 = vld [vmem:[%s3724_s28 + $0xc0] sm:$0xff] }
 0x203   : > { %2551 = vmatpush3.bf16.xpose.msra.mxu0 %v1432_v62  ;;  %2582 = vmatprep.subr.bf16.mxu1 %v1444_v15 }
 0x204   : > { %2552 = vmatprep.subr.bf16.mxu0 %v1433_v63 }
 0x206   : > { %2583 = vmatpush3.bf16.msra.mxu1 %v1444_v15 }
 0x207   : > { %2584 = vmatprep.subr.bf16.mxu1 %v1445_v17 }
 0x20a   : > { %2585 = vmatpush3.bf16.msra.mxu1 %v1445_v17 }
 0x20b   : > { %2553 = vmatpush3.bf16.xpose.msra.mxu0 %v1433_v63  ;;  %2586 = vmatprep.subr.bf16.mxu1 %v1446_v52  ;;  %v1448_v63 = vld [vmem:[%s3724_s28 + $0xf0] sm:$0xff] }
 0x20c   : > { %2554 = vmatprep.subr.bf16.mxu0 %v1434_v0 }
 0x20e   : > { %2587 = vmatpush3.bf16.msra.mxu1 %v1446_v52 }
 0x20f   : > { %2588 = vmatprep.subr.bf16.mxu1 %v1447_v16 }
 0x212   : > { %2589 = vmatpush3.bf16.msra.mxu1 %v1447_v16 }
 0x213   : > { %2555 = vmatpush3.bf16.xpose.msra.mxu0 %v1434_v0  ;;  %2590 = vmatprep.subr.bf16.mxu1 %v1448_v63 }
 0x214   : > { %2556 = vmatprep.subr.bf16.mxu0 %v1435_v1 }
 0x216   : > { %2591 = vmatpush3.bf16.msra.mxu1 %v1448_v63 }
 0x21b   : > { %2557 = vmatpush3.bf16.xpose.msra.mxu0 %v1435_v1 }
 0x21c   : > { %2558 = vmatprep.subr.bf16.mxu0 %v1436_v2 }
 0x223   : > { %2559 = vmatpush3.bf16.xpose.msra.mxu0 %v1436_v2 }
 0x224   : > { %2560 = vmatprep.subr.bf16.mxu0 %v1437_v3 }
 0x22b   : > { %2561 = vmatpush3.bf16.xpose.msra.mxu0 %v1437_v3  ;;  %v1449_v3 = vld [vmem:[%s3724_s28 + $0x120] sm:$0xff] }
 0x22c   : > { %2562 = vmatprep.subr.bf16.mxu0 %v1438_v4  ;;  %2592 = vmatprep.subr.bf16.mxu1 %v1449_v3 }
 0x22d   : > { %2593 = vmatpush3.bf16.msra.mxu1 %v1449_v3 }
 0x233   : > { %2563 = vmatpush3.bf16.xpose.msra.mxu0 %v1438_v4 }
 0x23a   : > { %2565 = vmatmul.mubr.bf16.vlgmr.msra.gmra.mrb[0].mxu0 %v1420_v5  ;;  %v1450_v5 = vld [vmem:[%s3724_s28 + $0x150] sm:$0xff] }
 0x23b   : > { %2568 = vmatprep.mubr.bf16.mxu0 %v1421_v7  ;;  %2594 = vmatprep.subr.bf16.mxu1 %v1450_v5 }
 0x23c   : > { %2595 = vmatpush3.bf16.msra.mxu1 %v1450_v5 }
 0x242   : > { %2569 = vmatmul.mubr.bf16.gmra.mrb[4].mxu0 %v1422_v8 }
 0x243   : > { %2572 = vmatprep.mubr.bf16.mxu0 %v1423_v9 }
 0x24a   : > { %2573 = vmatmul.mubr.bf16.gmra.mrb[8].mxu0 %v1424_v10 }
 0x24b   : > { %2576 = vmatprep.mubr.bf16.mxu0 %v1425_v12 }
 0x252   : > { %2577 = vmatmul.mubr.bf16.gmra.mrb[12].mxu0 %v1426_v13 }
 0x30d   : > { %v2566_v22 = vpop.f32.mrb[0].mxu0 }
 0x30e   : > { %v1485_v26 = vpop.f32.mrb[1].mxu0  ;;  %v3739_v27 = vsel %vm1569_vm0, %v2566_v22, -1e+30 }
 0x30f   : > { %1603 = vmax.xlane.f32.xlu1 %v3739_v27  ;;  %v2567_v29 = vpop.f32.mrb[2].mxu0  ;;  %v3742_v30 = vsel %vm1567_vm1, %v1485_v26, -1e+30 }
 0x310   : > { %1599 = vmax.xlane.f32.xlu0 %v3742_v30  ;;  %v1488_v31 = vpop.f32.mrb[3].mxu0  ;;  %v3748_v33 = vsel %vm1570_vm2, %v2567_v29, -1e+30 }
 0x311   : > { %v3752_v35 = vsel %vm1568_vm3, %v1488_v31, -1e+30 }
 0x313   : > { %1605 = vmax.xlane.f32.xlu1 %v3748_v33 }
 0x314   : > { %1601 = vmax.xlane.f32.xlu0 %v3752_v35 }
 0x315   : > { %v2570_v37 = vpop.f32.mrb[4].mxu0 }
 0x316   : > { %v1501_v38 = vpop.f32.mrb[5].mxu0  ;;  %v3769_v45 = vsel %vm1573_vm6, %v2570_v37, -1e+30 }
 0x317   : > { %v2571_v40 = vpop.f32.mrb[6].mxu0  ;;  %v3759_v41 = vsel %vm1571_vm4, %v1501_v38, -1e+30 }
 0x318   : > { %1607 = vmax.xlane.f32.xlu0 %v3759_v41  ;;  %v1504_v42 = vpop.f32.mrb[7].mxu0  ;;  %v3774_v6 = vsel %vm1574_vm7, %v2571_v40, -1e+30 }
 0x319   : > { %v3764_v23 = vsel %vm1572_vm5, %v1504_v42, -1e+30 }
 0x31a   : > { %1609 = vmax.xlane.f32.xlu1 %v3764_v23 }
 0x31c   : > { %1611 = vmax.xlane.f32.xlu0 %v3769_v45 }
 0x31d   : > { %v2574_v47 = vpop.f32.mrb[8].mxu0 }
 0x31e   : > { %1613 = vmax.xlane.f32.xlu1 %v3774_v6  ;;  %v1517_v28 = vpop.f32.mrb[9].mxu0  ;;  %v3790_v57 = vsel %vm1577_vm10, %v2574_v47, -1e+30 }
 0x31f   : > { %v2575_v49 = vpop.f32.mrb[10].mxu0  ;;  %v3779_v50 = vsel %vm1575_vm8, %v1517_v28, -1e+30 }
 0x320   : > { %1615 = vmax.xlane.f32.xlu0 %v3779_v50  ;;  %v1520_v53 = vpop.f32.mrb[11].mxu0  ;;  %v3796_v60 = vsel %vm1578_vm11, %v2575_v49, -1e+30 }
 0x321   : > { %v3785_v55 = vsel %vm1576_vm9, %v1520_v53, -1e+30 }
 0x322   : > { %1617 = vmax.xlane.f32.xlu1 %v3785_v55 }
 0x324   : > { %1619 = vmax.xlane.f32.xlu0 %v3790_v57 }
 0x325   : > { %v2578_v59 = vpop.f32.mrb[12].mxu0 }
 0x326   : > { %1621 = vmax.xlane.f32.xlu1 %v3796_v60  ;;  %v1533_v61 = vpop.f32.mrb[13].mxu0  ;;  %v3810_v2 = vsel %vm1581_vm14, %v2578_v59, -1e+30 }
 0x327   : > { %v2579_v24 = vpop.f32.mrb[14].mxu0  ;;  %v3801_v62 = vsel %vm1579_vm12, %v1533_v61, -1e+30 }
 0x328   : > { %1623 = vmax.xlane.f32.xlu0 %v3801_v62  ;;  %v1536_v0 = vpop.f32.mrb[15].mxu0  ;;  %v3814_v4 = vsel %vm1582_vm15, %v2579_v24, -1e+30 }
 0x329   : > { %v3806_v1 = vsel %vm1580_vm13, %v1536_v0, -1e+30 }
 0x32a   : > { %1625 = vmax.xlane.f32.xlu1 %v3806_v1 }
 0x32c   : > { %1627 = vmax.xlane.f32.xlu0 %v3810_v2 }
 0x32e   : > { %1629 = vmax.xlane.f32.xlu1 %v3814_v4 }
 0x39c   : > { %v1604_v7 = vpop.xlane.xlu1 %1603 }
 0x39d   : > { %v1633_v8 = vsub.f32 %v3739_v27, %v1604_v7  ;;  %v1600_v9 = vpop.xlane.xlu0 %1599 }
 0x39e   : > { %v1631_v10 = vsub.f32 %v3742_v30, %v1600_v9 }
 0x39f   : > { %v1651_v12 = vmul.f32 1.442695, %v1633_v8 }
 0x3a0   : > { %v1647_v13 = vmul.f32 1.442695, %v1631_v10  ;;  %v1606_v14 = vpop.xlane.xlu1 %1605 }
 0x3a1   : > { %2927 = vpow2.f32 %v1651_v12  ;;  %v1634_v15 = vsub.f32 %v3748_v33, %v1606_v14  ;;  %v1602_v17 = vpop.xlane.xlu0 %1601 }
 0x3a2   : > { %v1632_v18 = vsub.f32 %v3752_v35, %v1602_v17  ;;  %2929 = vpow2.f32 %v1647_v13 }
 0x3a3   : > { %v1653_v51 = vmul.f32 1.442695, %v1634_v15 }
 0x3a4   : > { %v1649_v11 = vmul.f32 1.442695, %v1632_v18 }
 0x3a5   : > { %2931 = vpow2.f32 %v1653_v51  ;;  %v1608_v20 = vpop.xlane.xlu0 %1607 }
 0x3a6   : > { %2933 = vpow2.f32 %v1649_v11  ;;  %v1635_v21 = vsub.f32 %v3759_v41, %v1608_v20 }
 0x3a7   : > { %v1610_v22 = vpop.xlane.xlu1 %1609 }
 0x3a8   : > { %v1655_v26 = vmul.f32 1.442695, %v1635_v21  ;;  %v1636_v27 = vsub.f32 %v3764_v23, %v1610_v22 }
 0x3a9   : > { %v1612_v29 = vpop.xlane.xlu0 %1611 }
 0x3aa   : > { %v1657_v30 = vmul.f32 1.442695, %v1636_v27  ;;  %v1637_v31 = vsub.f32 %v3769_v45, %v1612_v29  ;;  %2935 = vpow2.f32 %v1655_v26 }
 0x3ab   : > { %v2928_v32 = vpop.eup %2927  ;;  %v1614_v33 = vpop.xlane.xlu1 %1613 }
 0x3ac   : > { %2937 = vpow2.f32 %v1657_v30  ;;  %v1659_v34 = vmul.f32 1.442695, %v1637_v31  ;;  %v1638_v35 = vsub.f32 %v3774_v6, %v1614_v33  ;;  %1683 = vadd.xlane.f32.xlu0 %v2928_v32  ;;  %v2930_v37 = vpop.eup %2929 }
 0x3ad   : > { %v1616_v36 = vpop.xlane.xlu0 %1615 }
 0x3ae   : > { %2939 = vpow2.f32 %v1659_v34  ;;  %v1661_v38 = vmul.f32 1.442695, %v1638_v35  ;;  %v1639_v39 = vsub.f32 %v3779_v50, %v1616_v36 }
 0x3af   : > { %v2932_v40 = vpop.eup %2931  ;;  %v1618_v41 = vpop.xlane.xlu1 %1617 }
 0x3b0   : > { %v2934_v42 = vpop.eup %2933  ;;  %2941 = vpow2.f32 %v1661_v38  ;;  %v1663_v43 = vmul.f32 1.442695, %v1639_v39  ;;  %v1640_v23 = vsub.f32 %v3785_v55, %v1618_v41  ;;  %1679 = vadd.xlane.f32.xlu0 %v2930_v37  ;;  %1685 = vadd.xlane.f32.xlu1 %v2932_v40  ;;  %v1728_v6 = vpack.c.bf16 %v2932_v40, %v2928_v32 }
 0x3b1   : > { %v1620_v44 = vpop.xlane.xlu0 %1619  ;;  %v1727_v45 = vpack.c.bf16 %v2934_v42, %v2930_v37 }
 0x3b2   : > { %v1665_v46 = vmul.f32 1.442695, %v1640_v23  ;;  %v1641_v47 = vsub.f32 %v3790_v57, %v1620_v44  ;;  %2943 = vpow2.f32 %v1663_v43 }
 0x3b3   : > { %2596 = vmatprep.mubr.bf16.mxu1 %v1727_v45  ;;  %v1622_v28 = vpop.xlane.xlu1 %1621 }
 0x3b4   : > { %2945 = vpow2.f32 %v1665_v46  ;;  %v1667_v48 = vmul.f32 1.442695, %v1641_v47  ;;  %v1642_v49 = vsub.f32 %v3796_v60, %v1622_v28  ;;  %2597 = vmatmul.mubr.bf16.vlgmr.msra.gmra.mrb[0].mxu1 %v1728_v6  ;;  %1681 = vadd.xlane.f32.xlu1 %v2934_v42  ;;  %v2936_v50 = vpop.eup %2935 }
 0x3b5   : > { %v1624_v52 = vpop.xlane.xlu0 %1623 }
 0x3b6   : > { %v2938_v53 = vpop.eup %2937  ;;  %2947 = vpow2.f32 %v1667_v48  ;;  %v1669_v54 = vmul.f32 1.442695, %v1642_v49  ;;  %v1643_v55 = vsub.f32 %v3801_v62, %v1624_v52 }
 0x3b7   : > { %v1626_v56 = vpop.xlane.xlu1 %1625  ;;  %v1729_v16 = vpack.c.bf16 %v2938_v53, %v2936_v50 }
 0x3b8   : > { %v2940_v57 = vpop.eup %2939  ;;  %2949 = vpow2.f32 %v1669_v54  ;;  %v1671_v58 = vmul.f32 1.442695, %v1643_v55  ;;  %v1644_v59 = vsub.f32 %v3806_v1, %v1626_v56 }
 0x3b9   : > { %2600 = vmatprep.mubr.bf16.mxu1 %v1729_v16  ;;  %1691 = vadd.xlane.f32.xlu0 %v2940_v57  ;;  %v1628_v61 = vpop.xlane.xlu0 %1627 }
 0x3ba   : > { %v2942_v60 = vpop.eup %2941  ;;  %v1673_v25 = vmul.f32 1.442695, %v1644_v59  ;;  %v1645_v24 = vsub.f32 %v3810_v2, %v1628_v61  ;;  %2951 = vpow2.f32 %v1671_v58 }
 0x3bb   : > { %1693 = vadd.xlane.f32.xlu1 %v2942_v60  ;;  %v1630_v63 = vpop.xlane.xlu1 %1629  ;;  %v1730_v0 = vpack.c.bf16 %v2942_v60, %v2940_v57 }
 0x3bc   : > { %2953 = vpow2.f32 %v1673_v25  ;;  %v1675_v62 = vmul.f32 1.442695, %v1645_v24  ;;  %v1646_v3 = vsub.f32 %v3814_v4, %v1630_v63  ;;  %v2944_v5 = vpop.eup %2943 }
 0x3bd   : > { %2601 = vmatmul.mubr.bf16.gmra.mrb[4].mxu1 %v1730_v0  ;;  %1687 = vadd.xlane.f32.xlu0 %v2936_v50 }
 0x3be   : > { %v2946_v7 = vpop.eup %2945  ;;  %v1677_v1 = vmul.f32 1.442695, %v1646_v3  ;;  %2955 = vpow2.f32 %v1675_v62 }
 0x3bf   : > { %1689 = vadd.xlane.f32.xlu1 %v2938_v53  ;;  %v1731_v8 = vpack.c.bf16 %v2946_v7, %v2944_v5 }
 0x3c0   : > { %v2948_v9 = vpop.eup %2947  ;;  %2957 = vpow2.f32 %v1677_v1 }
 0x3c1   : > { %2604 = vmatprep.mubr.bf16.mxu1 %v1731_v8  ;;  %1699 = vadd.xlane.f32.xlu0 %v2948_v9 }
 0x3c2   : > { %v2950_v2 = vpop.eup %2949 }
 0x3c3   : > { %1701 = vadd.xlane.f32.xlu1 %v2950_v2  ;;  %v1732_v10 = vpack.c.bf16 %v2950_v2, %v2948_v9 }
 0x3c4   : > { %v2952_v12 = vpop.eup %2951 }
 0x3c5   : > { %2605 = vmatmul.mubr.bf16.gmra.mrb[8].mxu1 %v1732_v10  ;;  %1695 = vadd.xlane.f32.xlu0 %v2944_v5 }
 0x3c6   : > { %v2954_v13 = vpop.eup %2953 }
 0x3c7   : > { %1697 = vadd.xlane.f32.xlu1 %v2946_v7  ;;  %v1733_v4 = vpack.c.bf16 %v2954_v13, %v2952_v12 }
 0x3c8   : > { %v2956_v14 = vpop.eup %2955 }
 0x3c9   : > { %1703 = vadd.xlane.f32.xlu0 %v2952_v12  ;;  %2608 = vmatprep.mubr.bf16.mxu1 %v1733_v4 }
 0x3ca   : > { %v2958_v15 = vpop.eup %2957 }
 0x3cb   : > { %1705 = vadd.xlane.f32.xlu1 %v2954_v13  ;;  %v1734_v17 = vpack.c.bf16 %v2958_v15, %v2956_v14 }
 0x3cd   : > { %1707 = vadd.xlane.f32.xlu0 %v2956_v14  ;;  %2609 = vmatmul.mubr.bf16.gmra.mrb[12].mxu1 %v1734_v17 }
 0x3cf   : > { %1709 = vadd.xlane.f32.xlu1 %v2958_v15 }
 0x439   : > { %v1684_v18 = vpop.xlane.xlu0 %1683 }
 0x43a   : > { %2959 = vrcp.f32 %v1684_v18 }
 0x43d   : > { %v1686_v51 = vpop.xlane.xlu1 %1685  ;;  %v1680_v11 = vpop.xlane.xlu0 %1679 }
 0x43e   : > { %2961 = vrcp.f32 %v1680_v11 }
 0x43f   : > { %2963 = vrcp.f32 %v1686_v51 }
 0x441   : > { %v1682_v20 = vpop.xlane.xlu1 %1681 }
 0x442   : > { %2965 = vrcp.f32 %v1682_v20 }
 0x444   : > { %v2960_v31 = vpop.eup %2959 }
 0x446   : > { %v1692_v21 = vpop.xlane.xlu0 %1691 }
 0x447   : > { %2967 = vrcp.f32 %v1692_v21 }
 0x448   : > { %v1694_v22 = vpop.xlane.xlu1 %1693  ;;  %v2962_v33 = vpop.eup %2961 }
 0x449   : > { %2969 = vrcp.f32 %v1694_v22  ;;  %v2964_v36 = vpop.eup %2963 }
 0x44a   : > { %v1688_v26 = vpop.xlane.xlu0 %1687 }
 0x44b   : > { %2971 = vrcp.f32 %v1688_v26 }
 0x44c   : > { %v1690_v27 = vpop.xlane.xlu1 %1689  ;;  %v2966_v39 = vpop.eup %2965 }
 0x44d   : > { %2973 = vrcp.f32 %v1690_v27 }
 0x44e   : > { %v1700_v29 = vpop.xlane.xlu0 %1699 }
 0x44f   : > { %2975 = vrcp.f32 %v1700_v29 }
 0x450   : > { %v1702_v30 = vpop.xlane.xlu1 %1701 }
 0x451   : > { %2977 = vrcp.f32 %v1702_v30  ;;  %v2968_v6 = vpop.eup %2967  ;;  %v2991_v30 = vld [vmem:[#allocation9 + $0x4] ss:$8 sps:$4 sm:$0xff] (!%p2476_p4)  }
 0x452   : > { %v1696_v34 = vpop.xlane.xlu0 %1695  ;;  %2090 = vmatprep.subr.bf16.mxu0 (!%p2476_p4), %v2991_v30  ;;  %2644 = vmatprep.subr.bf16.mxu1 (!%p2476_p4), %v2991_v30 }
 0x453   : > { %2979 = vrcp.f32 %v1696_v34  ;;  %v2970_v48 = vpop.eup %2969  ;;  %v2997_v34 = vld [vmem:[#allocation9 + $0x24] ss:$8 sps:$4 sm:$0xff] (!%p2476_p4)  }
 0x454   : > { %v1698_v37 = vpop.xlane.xlu1 %1697 }
 0x455   : > { %2981 = vrcp.f32 %v1698_v37  ;;  %v2972_v50 = vpop.eup %2971  ;;  %v3002_v37 = vld [vmem:[#allocation9 + $0x30] ss:$8 sps:$4 sm:$0xff] (!%p2476_p4)  }
 0x456   : > { %v1704_v46 = vpop.xlane.xlu0 %1703 }
 0x457   : > { %v2974_v53 = vpop.eup %2973  ;;  %2983 = vrcp.f32 %v1704_v46  ;;  %v3014_v46 = vld [vmem:[#allocation9 + $0x70] ss:$8 sps:$4 sm:$0xff] (!%p2476_p4)  }
 0x458   : > { %v1706_v47 = vpop.xlane.xlu1 %1705 }
 0x459   : > { %v2976_v25 = vpop.eup %2975 }
 0x45a   : > { %v1708_v16 = vpop.xlane.xlu0 %1707 }
 0x45b   : > { %2985 = vrcp.f32 %v1708_v16  ;;  %v2978_v63 = vpop.eup %2977  ;;  %v3032_v16 = vld [vmem:[#allocation9 + $0xd0] ss:$8 sps:$4 sm:$0xff] (!%p2476_p4)  }
 0x45c   : > { %v1710_v59 = vpop.xlane.xlu1 %1709 }
 0x45d   : > { %2987 = vrcp.f32 %v1710_v59  ;;  %v2980_v62 = vpop.eup %2979  ;;  %v3036_v59 = vld [vmem:[#allocation9 + $0xf4] ss:$8 sps:$4 sm:$0xff] (!%p2476_p4)  }
 0x45e   : > { %2989 = vrcp.f32 %v1706_v47  ;;  %v3015_v47 = vld [vmem:[#allocation9 + $0x84] ss:$8 sps:$4 sm:$0xff] (!%p2476_p4)  }
 0x45f   : > { %v2982_v5 = vpop.eup %2981 }
 0x461   : > { %v2984_v13 = vpop.eup %2983 }
 0x465   : > { %v2986_v14 = vpop.eup %2985 }
 0x467   : > { %v2988_v17 = vpop.eup %2987 }
 0x468   : > { %v2990_v51 = vpop.eup %2989 }
 0x487   : > { %v2598_v32 = vpop.f32.mrb[0].mxu1 }
 0x488   : > { %v1769_v35 = vpop.f32.mrb[1].mxu1  ;;  %v1834_v40 = vmul.f32 %v2960_v31, %v2598_v32  ;;  %v2993_v31 = vld [vmem:[#allocation9] ss:$8 sps:$4 sm:$0xff] (!%p2476_p4)   ;;  %v2994_v32 = vld [vmem:[#allocation9 + $0x14] ss:$8 sps:$4 sm:$0xff] (!%p2476_p4)  }
 0x489   : > { %v2599_v38 = vpop.f32.mrb[2].mxu1  ;;  %v1832_v43 = vmul.f32 %v2962_v33, %v1769_v35  ;;  %2091 = vmatpush1.bf16.msra.mxu0 (!%p2476_p4), %v2993_v31  ;;  %2660 = vmatpush1.bf16.msra.mxu1 (!%p2476_p4), %v2993_v31  ;;  %v2996_v33 = vld [vmem:[#allocation9 + $0x10] ss:$8 sps:$4 sm:$0xff] (!%p2476_p4)   ;;  %v2999_v35 = vld [vmem:[#allocation9 + $0x20] ss:$8 sps:$4 sm:$0xff] (!%p2476_p4)  }
 0x48a   : > { %v1835_v41 = vmul.f32 %v2964_v36, %v2599_v38  ;;  %v1772_v42 = vpop.f32.mrb[3].mxu1  ;;  %2092 = vmatprep.subr.bf16.mxu0 (!%p2476_p4), %v2994_v32  ;;  %2645 = vmatprep.subr.bf16.mxu1 (!%p2476_p4), %v2994_v32  ;;  %v3000_v36 = vld [vmem:[#allocation9 + $0x34] ss:$8 sps:$4 sm:$0xff] (!%p2476_p4)   ;;  %v3003_v38 = vld [vmem:[#allocation9 + $0x44] ss:$8 sps:$4 sm:$0xff] (!%p2476_p4)  }
 0x48b   : > { %v1833_v23 = vmul.f32 %v2966_v39, %v1772_v42  ;;  %v3005_v39 = vld [vmem:[#allocation9 + $0x40] ss:$8 sps:$4 sm:$0xff] (!%p2476_p4)   ;;  %v3009_v42 = vld [vmem:[#allocation9 + $0x64] ss:$8 sps:$4 sm:$0xff] (!%p2476_p4)  }
 0x48c   : > { %v1849_v44 = vpack.c.bf16 %v1835_v41, %v1834_v40  ;;  %v3006_v40 = vld [vmem:[#allocation9 + $0x54] ss:$8 sps:$4 sm:$0xff] (!%p2476_p4)   ;;  %v3008_v41 = vld [vmem:[#allocation9 + $0x50] ss:$8 sps:$4 sm:$0xff] (!%p2476_p4)  }
 0x48d   : > { %v1848_v45 = vpack.c.bf16 %v1833_v23, %v1832_v43  ;;  %2093 = vmatpush1.bf16.msra.mxu0 (!%p2476_p4), %v2996_v33  ;;  %2661 = vmatpush1.bf16.msra.mxu1 (!%p2476_p4), %v2996_v33 }
 0x48e   : > { %1859 = vst [vmem:[%s3835_s30 + $0x10] sm:$0xff] %v1849_v44  ;;  %2094 = vmatprep.subr.bf16.mxu0 (!%p2476_p4), %v2997_v34  ;;  %2646 = vmatprep.subr.bf16.mxu1 (!%p2476_p4), %v2997_v34  ;;  %v3011_v44 = vld [vmem:[#allocation9 + $0x60] ss:$8 sps:$4 sm:$0xff] (!%p2476_p4)  }
 0x48f   : > { %1858 = vst [vmem:[%s3835_s30] sm:$0xff] %v1848_v45  ;;  %v3012_v45 = vld [vmem:[#allocation9 + $0x74] ss:$8 sps:$4 sm:$0xff] (!%p2476_p4)  }
 0x490   : > { %v2602_v28 = vpop.f32.mrb[4].mxu1 }
 0x491   : > { %v1785_v49 = vpop.f32.mrb[5].mxu1  ;;  %v1838_v54 = vmul.f32 %v2968_v6, %v2602_v28  ;;  %2095 = vmatpush1.bf16.msra.mxu0 (!%p2476_p4), %v2999_v35  ;;  %2662 = vmatpush1.bf16.msra.mxu1 (!%p2476_p4), %v2999_v35  ;;  %v3017_v6 = vld [vmem:[#allocation9 + $0x80] ss:$8 sps:$4 sm:$0xff] (!%p2476_p4)   ;;  %v3018_v28 = vld [vmem:[#allocation9 + $0x94] ss:$8 sps:$4 sm:$0xff] (!%p2476_p4)  }
 0x492   : > { %v2603_v52 = vpop.f32.mrb[6].mxu1  ;;  %v1836_v57 = vmul.f32 %v2972_v50, %v1785_v49  ;;  %2096 = vmatprep.subr.bf16.mxu0 (!%p2476_p4), %v3000_v36  ;;  %2647 = vmatprep.subr.bf16.mxu1 (!%p2476_p4), %v3000_v36  ;;  %v3021_v49 = vld [vmem:[#allocation9 + $0xa4] ss:$8 sps:$4 sm:$0xff] (!%p2476_p4)   ;;  %v3023_v50 = vld [vmem:[#allocation9 + $0xa0] ss:$8 sps:$4 sm:$0xff] (!%p2476_p4)  }
 0x493   : > { %v1839_v55 = vmul.f32 %v2970_v48, %v2603_v52  ;;  %v1788_v56 = vpop.f32.mrb[7].mxu1  ;;  %v3020_v48 = vld [vmem:[#allocation9 + $0x90] ss:$8 sps:$4 sm:$0xff] (!%p2476_p4)   ;;  %v3024_v52 = vld [vmem:[#allocation9 + $0xb4] ss:$8 sps:$4 sm:$0xff] (!%p2476_p4)  }
 0x494   : > { %v1837_v58 = vmul.f32 %v2974_v53, %v1788_v56  ;;  %v3026_v53 = vld [vmem:[#allocation9 + $0xb0] ss:$8 sps:$4 sm:$0xff] (!%p2476_p4)   ;;  %v3030_v56 = vld [vmem:[#allocation9 + $0xd4] ss:$8 sps:$4 sm:$0xff] (!%p2476_p4)  }
 0x495   : > { %v1851_v61 = vpack.c.bf16 %v1839_v55, %v1838_v54  ;;  %2097 = vmatpush1.bf16.msra.mxu0 (!%p2476_p4), %v3002_v37  ;;  %2663 = vmatpush1.bf16.msra.mxu1 (!%p2476_p4), %v3002_v37  ;;  %v3027_v54 = vld [vmem:[#allocation9 + $0xc4] ss:$8 sps:$4 sm:$0xff] (!%p2476_p4)   ;;  %v3029_v55 = vld [vmem:[#allocation9 + $0xc0] ss:$8 sps:$4 sm:$0xff] (!%p2476_p4)  }
 0x496   : > { %v1850_v60 = vpack.c.bf16 %v1837_v58, %v1836_v57  ;;  %2098 = vmatprep.subr.bf16.mxu0 (!%p2476_p4), %v3003_v38  ;;  %2648 = vmatprep.subr.bf16.mxu1 (!%p2476_p4), %v3003_v38  ;;  %v3033_v57 = vld [vmem:[#allocation9 + $0xe4] ss:$8 sps:$4 sm:$0xff] (!%p2476_p4)   ;;  %v3035_v58 = vld [vmem:[#allocation9 + $0xe0] ss:$8 sps:$4 sm:$0xff] (!%p2476_p4)  }
 0x497   : > { %1861 = vst [vmem:[%s3835_s30 + $0x30] sm:$0xff] %v1851_v61  ;;  %v3038_v61 = vld [vmem:[#allocation9 + $0xf0] ss:$8 sps:$4 sm:$0xff] (!%p2476_p4)  }
 0x498   : > { %1860 = vst [vmem:[%s3835_s30 + $0x20] sm:$0xff] %v1850_v60  ;;  %v2606_v24 = vpop.f32.mrb[8].mxu1 }
 0x499   : > { %v1801_v0 = vpop.f32.mrb[9].mxu1  ;;  %v1842_v7 = vmul.f32 %v2976_v25, %v2606_v24  ;;  %2099 = vmatpush1.bf16.msra.mxu0 (!%p2476_p4), %v3005_v39  ;;  %2664 = vmatpush1.bf16.msra.mxu1 (!%p2476_p4), %v3005_v39 }
 0x49a   : > { %v2607_v3 = vpop.f32.mrb[10].mxu1  ;;  %v1840_v9 = vmul.f32 %v2980_v62, %v1801_v0  ;;  %2100 = vmatprep.subr.bf16.mxu0 (!%p2476_p4), %v3006_v40  ;;  %2649 = vmatprep.subr.bf16.mxu1 (!%p2476_p4), %v3006_v40 }
 0x49b   : > { %v1843_v1 = vmul.f32 %v2978_v63, %v2607_v3  ;;  %v1804_v8 = vpop.f32.mrb[11].mxu1 }
 0x49c   : > { %v1841_v2 = vmul.f32 %v2982_v5, %v1804_v8 }
 0x49d   : > { %v1853_v10 = vpack.c.bf16 %v1843_v1, %v1842_v7  ;;  %2101 = vmatpush1.bf16.msra.mxu0 (!%p2476_p4), %v3008_v41  ;;  %2665 = vmatpush1.bf16.msra.mxu1 (!%p2476_p4), %v3008_v41 }
 0x49e   : > { %v1852_v12 = vpack.c.bf16 %v1841_v2, %v1840_v9  ;;  %2102 = vmatprep.subr.bf16.mxu0 (!%p2476_p4), %v3009_v42  ;;  %2650 = vmatprep.subr.bf16.mxu1 (!%p2476_p4), %v3009_v42 }
 0x49f   : > { %1863 = vst [vmem:[%s3835_s30 + $0x50] sm:$0xff] %v1853_v10 }
 0x4a0   : > { %1862 = vst [vmem:[%s3835_s30 + $0x40] sm:$0xff] %v1852_v12  ;;  %v2610_v4 = vpop.f32.mrb[12].mxu1  ;;  %v1922_v12 = vsub.s32 (!%p2476_p4), 0, %v3729_v19 }
 0x4a1   : > { %v1817_v15 = vpop.f32.mrb[13].mxu1  ;;  %v1846_v11 = vmul.f32 %v2986_v14, %v2610_v4  ;;  %2103 = vmatpush1.bf16.msra.mxu0 (!%p2476_p4), %v3011_v44  ;;  %2666 = vmatpush1.bf16.msra.mxu1 (!%p2476_p4), %v3011_v44  ;;  %v1926_v4 = vsub.s32 (!%p2476_p4), 1, %v3729_v19 }
 0x4a2   : > { %v2611_v18 = vpop.f32.mrb[14].mxu1  ;;  %v1844_v22 = vmul.f32 %v2984_v13, %v1817_v15  ;;  %1869 = sbr.rel (%p2476_p4) target bundleno = 1467 (0x5bb), region = 60  ;;  %2104 = vmatprep.subr.bf16.mxu0 (!%p2476_p4), %v3012_v45  ;;  %2651 = vmatprep.subr.bf16.mxu1 (!%p2476_p4), %v3012_v45  ;;  %v1918_v13 = vld [vmem:[%s3984_s4] sm:$0x3] (!%p2476_p4) }
 0x4a3   : > { %v1847_v20 = vmul.f32 %v2988_v17, %v2611_v18  ;;  %v1820_v21 = vpop.f32.mrb[15].mxu1  ;;  %v3851_v14 = vrot.slane (!%p2476_p4), %v1918_v13, %v1922_v12  ;;  %v3853_v15 = vrot.slane (!%p2476_p4), %v1918_v13, %v1926_v4 }
 0x4a4   : > { %v1845_v26 = vmul.f32 %v2990_v51, %v1820_v21 }
 0x4a5   : > { %v1855_v27 = vpack.c.bf16 %v1847_v20, %v1846_v11  ;;  %2105 = vmatpush1.bf16.msra.mxu0 (!%p2476_p4), %v3014_v46  ;;  %2667 = vmatpush1.bf16.msra.mxu1 (!%p2476_p4), %v3014_v46 }
 0x4a6   : > { %v1854_v29 = vpack.c.bf16 %v1845_v26, %v1844_v22  ;;  %2106 = vmatprep.subr.bf16.mxu0 (!%p2476_p4), %v3015_v47  ;;  %2652 = vmatprep.subr.bf16.mxu1 (!%p2476_p4), %v3015_v47 }
 0x4a7   : > { %1865 = vst [vmem:[%s3835_s30 + $0x70] sm:$0xff] %v1855_v27 }
 0x4a8   : > { %1864 = vst [vmem:[%s3835_s30 + $0x60] sm:$0xff] %v1854_v29 }
 0x4a9   : > { %2107 = vmatpush1.bf16.msra.mxu0 %v3017_v6  ;;  %2668 = vmatpush1.bf16.msra.mxu1 %v3017_v6 }
 0x4aa   : > { %2108 = vmatprep.subr.bf16.mxu0 %v3018_v28  ;;  %2653 = vmatprep.subr.bf16.mxu1 %v3018_v28 }
 0x4ad   : > { %2109 = vmatpush1.bf16.msra.mxu0 %v3020_v48  ;;  %2669 = vmatpush1.bf16.msra.mxu1 %v3020_v48 }
 0x4ae   : > { %2110 = vmatprep.subr.bf16.mxu0 %v3021_v49  ;;  %2654 = vmatprep.subr.bf16.mxu1 %v3021_v49 }
 0x4af   : > { %v1871_v43 = vld [vmem:[#allocation3 + $0x8] sm:$0xff]  ;;  %v1870_v60 = vld [vmem:[#allocation3] sm:$0xff]  ;;  %v1873_v24 = vld [vmem:[#allocation3 + $0x18] sm:$0xff] }
 0x4b0   : > { %v1879_v23 = vld [vmem:[#allocation3 + $0x48] sm:$0xff]  ;;  %2122 = vmatprep.mubr.bf16.mxu0 %v1871_v43  ;;  %v1878_v25 = vld [vmem:[#allocation3 + $0x40] sm:$0xff]  ;;  %v1881_v63 = vld [vmem:[#allocation3 + $0x58] sm:$0xff] }
 0x4b1   : > { %2162 = vmatprep.mubr.bf16.mxu1 %v1879_v23  ;;  %2111 = vmatpush1.bf16.msra.mxu0 %v3023_v50  ;;  %v1872_v0 = vld [vmem:[#allocation3 + $0x10] sm:$0xff]  ;;  %v1875_v3 = vld [vmem:[#allocation3 + $0x28] sm:$0xff]  ;;  %v1874_v7 = vld [vmem:[#allocation3 + $0x20] sm:$0xff] }
 0x4b2   : > { %2670 = vmatpush1.bf16.msra.mxu1 %v3023_v50  ;;  %2112 = vmatprep.subr.bf16.mxu0 %v3024_v52  ;;  %v1880_v62 = vld [vmem:[#allocation3 + $0x50] sm:$0xff]  ;;  %v1883_v5 = vld [vmem:[#allocation3 + $0x68] sm:$0xff]  ;;  %v1882_v1 = vld [vmem:[#allocation3 + $0x60] sm:$0xff] }
 0x4b3   : > { %2655 = vmatprep.subr.bf16.mxu1 %v3024_v52  ;;  %v1877_v8 = vld [vmem:[#allocation3 + $0x38] sm:$0xff]  ;;  %v1876_v2 = vld [vmem:[#allocation3 + $0x30] sm:$0xff] }
 0x4b4   : > { %v1885_v9 = vld [vmem:[#allocation3 + $0x78] sm:$0xff]  ;;  %v1884_v10 = vld [vmem:[#allocation3 + $0x70] sm:$0xff] }
 0x4b5   : > { %2113 = vmatpush1.bf16.msra.mxu0 %v3026_v53 }
 0x4b6   : > { %2671 = vmatpush1.bf16.msra.mxu1 %v3026_v53  ;;  %2114 = vmatprep.subr.bf16.mxu0 %v3027_v54 }
 0x4b7   : > { %2656 = vmatprep.subr.bf16.mxu1 %v3027_v54 }
 0x4b9   : > { %2115 = vmatpush1.bf16.msra.mxu0 %v3029_v55 }
 0x4ba   : > { %2672 = vmatpush1.bf16.msra.mxu1 %v3029_v55  ;;  %2116 = vmatprep.subr.bf16.mxu0 %v3030_v56 }
 0x4bb   : > { %2657 = vmatprep.subr.bf16.mxu1 %v3030_v56 }
 0x4bd   : > { %2117 = vmatpush1.bf16.msra.mxu0 %v3032_v16 }
 0x4be   : > { %2673 = vmatpush1.bf16.msra.mxu1 %v3032_v16  ;;  %2118 = vmatprep.subr.bf16.mxu0 %v3033_v57 }
 0x4bf   : > { %2658 = vmatprep.subr.bf16.mxu1 %v3033_v57 }
 0x4c1   : > { %2119 = vmatpush1.bf16.msra.mxu0 %v3035_v58 }
 0x4c2   : > { %2674 = vmatpush1.bf16.msra.mxu1 %v3035_v58  ;;  %2120 = vmatprep.subr.bf16.mxu0 %v3036_v59 }
 0x4c3   : > { %2659 = vmatprep.subr.bf16.mxu1 %v3036_v59 }
 0x4c5   : > { %2121 = vmatpush1.bf16.msra.mxu0 %v3038_v61 }
 0x4c6   : > { %2675 = vmatpush1.bf16.msra.mxu1 %v3038_v61 }
 0x4c8   : > { %2123 = vmatmul.mubr.bf16.vlgmr.msra.gmra.mrb[0].mxu0 %v1870_v60 }
 0x4c9   : > { %2163 = vmatmul.mubr.bf16.vlgmr.msra.gmra.mrb[0].mxu1 %v1878_v25  ;;  %2132 = vmatprep.mubr.bf16.mxu0 %v1873_v24 }
 0x4ca   : > { %2172 = vmatprep.mubr.bf16.mxu1 %v1881_v63 }
 0x4d0   : > { %2133 = vmatmul.mubr.bf16.gmra.mrb[4].mxu0 %v1872_v0 }
 0x4d1   : > { %2173 = vmatmul.mubr.bf16.gmra.mrb[4].mxu1 %v1880_v62  ;;  %2142 = vmatprep.mubr.bf16.mxu0 %v1875_v3 }
 0x4d2   : > { %2182 = vmatprep.mubr.bf16.mxu1 %v1883_v5 }
 0x4d8   : > { %2143 = vmatmul.mubr.bf16.gmra.mrb[8].mxu0 %v1874_v7 }
 0x4d9   : > { %2183 = vmatmul.mubr.bf16.gmra.mrb[8].mxu1 %v1882_v1  ;;  %2152 = vmatprep.mubr.bf16.mxu0 %v1877_v8 }
 0x4da   : > { %2192 = vmatprep.mubr.bf16.mxu1 %v1885_v9 }
 0x4e0   : > { %2153 = vmatmul.mubr.bf16.gmra.mrb[12].mxu0 %v1876_v2 }
 0x4e1   : > { %2193 = vmatmul.mubr.bf16.gmra.mrb[12].mxu1 %v1884_v10 }
 0x59b   : > { %v2124_v17 = vpop.f32.mrb[0].mxu0 }
 0x59c   : > { %v2164_v18 = vpop.f32.mrb[0].mxu1  ;;  %v2125_v51 = vadd.f32 %v2124_v17, %v3851_v14  ;;  %v2126_v20 = vpop.f32.mrb[1].mxu0 }
 0x59d   : > { %v2165_v11 = vadd.f32 %v2164_v18, %v3851_v14  ;;  %v2166_v21 = vpop.f32.mrb[1].mxu1  ;;  %v2127_v22 = vadd.f32 %v2126_v20, %v3853_v15  ;;  %v2128_v26 = vpop.f32.mrb[2].mxu0 }
 0x59e   : > { %v2167_v19 = vadd.f32 %v2166_v21, %v3853_v15  ;;  %v2168_v27 = vpop.f32.mrb[2].mxu1  ;;  %2203 = vst [vmem:[%s3483_s7] sm:$0xff] %v2125_v51  ;;  %v2129_v29 = vadd.f32 %v2128_v26, %v3851_v14  ;;  %v2130_v31 = vpop.f32.mrb[3].mxu0 }
 0x59f   : > { %2219 = vst [vmem:[%s3483_s7 + $0x80] sm:$0xff] %v2165_v11  ;;  %v2169_v30 = vadd.f32 %v2168_v27, %v3851_v14  ;;  %v2170_v32 = vpop.f32.mrb[3].mxu1  ;;  %2204 = vst [vmem:[%s3483_s7 + $0x8] sm:$0xff] %v2127_v22  ;;  %v2131_v33 = vadd.f32 %v2130_v31, %v3853_v15 }
 0x5a0   : > { %2220 = vst [vmem:[%s3483_s7 + $0x88] sm:$0xff] %v2167_v19  ;;  %v2171_v34 = vadd.f32 %v2170_v32, %v3853_v15  ;;  %2205 = vst [vmem:[%s3483_s7 + $0x10] sm:$0xff] %v2129_v29 }
 0x5a1   : > { %2221 = vst [vmem:[%s3483_s7 + $0x90] sm:$0xff] %v2169_v30  ;;  %2206 = vst [vmem:[%s3483_s7 + $0x18] sm:$0xff] %v2131_v33 }
 0x5a2   : > { %2222 = vst [vmem:[%s3483_s7 + $0x98] sm:$0xff] %v2171_v34 }
 0x5a3   : > { %v2134_v35 = vpop.f32.mrb[4].mxu0 }
 0x5a4   : > { %v2174_v36 = vpop.f32.mrb[4].mxu1  ;;  %v2135_v37 = vadd.f32 %v2134_v35, %v3851_v14  ;;  %v2136_v39 = vpop.f32.mrb[5].mxu0 }
 0x5a5   : > { %v2175_v38 = vadd.f32 %v2174_v36, %v3851_v14  ;;  %v2176_v40 = vpop.f32.mrb[5].mxu1  ;;  %v2137_v41 = vadd.f32 %v2136_v39, %v3853_v15  ;;  %v2138_v43 = vpop.f32.mrb[6].mxu0 }
 0x5a6   : > { %v2177_v42 = vadd.f32 %v2176_v40, %v3853_v15  ;;  %v2178_v23 = vpop.f32.mrb[6].mxu1  ;;  %2207 = vst [vmem:[%s3483_s7 + $0x20] sm:$0xff] %v2135_v37  ;;  %v2139_v44 = vadd.f32 %v2138_v43, %v3851_v14  ;;  %v2140_v46 = vpop.f32.mrb[7].mxu0 }
 0x5a7   : > { %2223 = vst [vmem:[%s3483_s7 + $0xa0] sm:$0xff] %v2175_v38  ;;  %v2179_v45 = vadd.f32 %v2178_v23, %v3851_v14  ;;  %v2180_v47 = vpop.f32.mrb[7].mxu1  ;;  %2208 = vst [vmem:[%s3483_s7 + $0x28] sm:$0xff] %v2137_v41  ;;  %v2141_v6 = vadd.f32 %v2140_v46, %v3853_v15 }
 0x5a8   : > { %2224 = vst [vmem:[%s3483_s7 + $0xa8] sm:$0xff] %v2177_v42  ;;  %v2181_v28 = vadd.f32 %v2180_v47, %v3853_v15  ;;  %2209 = vst [vmem:[%s3483_s7 + $0x30] sm:$0xff] %v2139_v44 }
 0x5a9   : > { %2225 = vst [vmem:[%s3483_s7 + $0xb0] sm:$0xff] %v2179_v45  ;;  %2210 = vst [vmem:[%s3483_s7 + $0x38] sm:$0xff] %v2141_v6 }
 0x5aa   : > { %2226 = vst [vmem:[%s3483_s7 + $0xb8] sm:$0xff] %v2181_v28 }
 0x5ab   : > { %v2144_v48 = vpop.f32.mrb[8].mxu0 }
 0x5ac   : > { %v2184_v49 = vpop.f32.mrb[8].mxu1  ;;  %v2145_v50 = vadd.f32 %v2144_v48, %v3851_v14  ;;  %v2146_v53 = vpop.f32.mrb[9].mxu0 }
 0x5ad   : > { %v2185_v52 = vadd.f32 %v2184_v49, %v3851_v14  ;;  %v2186_v54 = vpop.f32.mrb[9].mxu1  ;;  %v2147_v55 = vadd.f32 %v2146_v53, %v3853_v15  ;;  %v2148_v16 = vpop.f32.mrb[10].mxu0 }
 0x5ae   : > { %v2187_v56 = vadd.f32 %v2186_v54, %v3853_v15  ;;  %v2188_v57 = vpop.f32.mrb[10].mxu1  ;;  %2211 = vst [vmem:[%s3483_s7 + $0x40] sm:$0xff] %v2145_v50  ;;  %v2149_v58 = vadd.f32 %v2148_v16, %v3851_v14  ;;  %v2150_v61 = vpop.f32.mrb[11].mxu0 }
 0x5af   : > { %2227 = vst [vmem:[%s3483_s7 + $0xc0] sm:$0xff] %v2185_v52  ;;  %v2189_v59 = vadd.f32 %v2188_v57, %v3851_v14  ;;  %v2190_v60 = vpop.f32.mrb[11].mxu1  ;;  %2212 = vst [vmem:[%s3483_s7 + $0x48] sm:$0xff] %v2147_v55  ;;  %v2151_v25 = vadd.f32 %v2150_v61, %v3853_v15 }
 0x5b0   : > { %2228 = vst [vmem:[%s3483_s7 + $0xc8] sm:$0xff] %v2187_v56  ;;  %v2191_v24 = vadd.f32 %v2190_v60, %v3853_v15  ;;  %2213 = vst [vmem:[%s3483_s7 + $0x50] sm:$0xff] %v2149_v58 }
 0x5b1   : > { %2229 = vst [vmem:[%s3483_s7 + $0xd0] sm:$0xff] %v2189_v59  ;;  %2214 = vst [vmem:[%s3483_s7 + $0x58] sm:$0xff] %v2151_v25 }
 0x5b2   : > { %2230 = vst [vmem:[%s3483_s7 + $0xd8] sm:$0xff] %v2191_v24 }
 0x5b3   : > { %v2154_v63 = vpop.f32.mrb[12].mxu0 }
 0x5b4   : > { %v2194_v0 = vpop.f32.mrb[12].mxu1  ;;  %v2155_v62 = vadd.f32 %v2154_v63, %v3851_v14  ;;  %v2156_v5 = vpop.f32.mrb[13].mxu0 }
 0x5b5   : > { %v2195_v3 = vadd.f32 %v2194_v0, %v3851_v14  ;;  %v2196_v7 = vpop.f32.mrb[13].mxu1  ;;  %v2157_v1 = vadd.f32 %v2156_v5, %v3853_v15  ;;  %v2158_v9 = vpop.f32.mrb[14].mxu0 }
 0x5b6   : > { %v2197_v8 = vadd.f32 %v2196_v7, %v3853_v15  ;;  %v2198_v2 = vpop.f32.mrb[14].mxu1  ;;  %2215 = vst [vmem:[%s3483_s7 + $0x60] sm:$0xff] %v2155_v62  ;;  %v2159_v10 = vadd.f32 %v2158_v9, %v3851_v14  ;;  %v2160_v13 = vpop.f32.mrb[15].mxu0 }
 0x5b7   : > { %2231 = vst [vmem:[%s3483_s7 + $0xe0] sm:$0xff] %v2195_v3  ;;  %v2199_v12 = vadd.f32 %v2198_v2, %v3851_v14  ;;  %v2200_v4 = vpop.f32.mrb[15].mxu1  ;;  %2216 = vst [vmem:[%s3483_s7 + $0x68] sm:$0xff] %v2157_v1  ;;  %v2161_v17 = vadd.f32 %v2160_v13, %v3853_v15 }
 0x5b8   : > { %2232 = vst [vmem:[%s3483_s7 + $0xe8] sm:$0xff] %v2197_v8  ;;  %v2201_v18 = vadd.f32 %v2200_v4, %v3853_v15  ;;  %2217 = vst [vmem:[%s3483_s7 + $0x70] sm:$0xff] %v2159_v10 }
 0x5b9   : > { %2233 = vst [vmem:[%s3483_s7 + $0xf0] sm:$0xff] %v2199_v12  ;;  %2218 = vst [vmem:[%s3483_s7 + $0x78] sm:$0xff] %v2161_v17 }
 0x5ba   : > { %2234 = vst [vmem:[%s3483_s7 + $0xf8] sm:$0xff] %v2201_v18 }
 0x5bb PF: > { %s2515_s11 = sshll.u32 %s3215_s22, 12  ;;  %s2249_s27 = sshll.u32 %s3483_s7, 4  ;;  %s3926_s27 = int_to_ptr.vmem [resolvable:$true] %s2249_s27 }
 0x5bc   : > { %s3923_s17 = scalar_lea.hbm %s3985_s5, %s2515_s11  ;;  %s2236_s26 = scalar_lea.sflag [#allocation6], %s3469_s18 }
 0x5bd   : > { %s3125_s9 = scalar_lea.vmem %s3926_s27, 4096  ;;  %s3238_s29 = smov [#allocation10]  }
 0x5be   : > { %p3126_p10 = scmp.ne.s32.totalorder %s3926_s27, %s3125_s9  ;;  %s3129_s16 = sshll.u32 %s3238_s29, 4  ;;  %s3130_s16 = int_to_ptr.vmem [resolvable:$false] %s3129_s16 }
 0x5bf   : > { %s3131_s22 = scalar_lea.vmem %s3130_s16, 8192  ;;  %p3132_p3 = scmp.lt.s32.totalorder %s3926_s27, %s3130_s16 }
 0x5c0   : > { %p3127_p8 = pnand %p3126_p10, %p3411_p6  ;;  %p3133_p7 = scmp.lt.s32.totalorder %s3131_s22, %s3125_s9 }
 0x5c2   : > { %p3128_p13 = pneg %p3127_p8  ;;  %p3134_p12 = por %p3133_p7, %p3132_p3 }
 0x5c4   : > { %p3135_p11 = pnand %p3134_p12, %p3128_p13 }
 0x5c6   : > { %3138 = shalt.err (!%p3135_p11)
}
 0x5c7   : > { %s3139_s7 = scalar_lea.hbm %s3923_s17, 4096  ;;  %s3143_s30 = scalar_lea.hbm %s3985_s5, 8192 }
 0x5c8   : > { %p3140_p1 = scmp.ne.s32.totalorder %s3923_s17, %s3139_s7  ;;  %p3144_p0 = scmp.lt.u32.totalorder %s3923_s17, %s3985_s5 }
 0x5c9   : > { %p3145_p2 = scmp.lt.u32.totalorder %s3143_s30, %s3139_s7  ;;  %p3147_p10 = scmp.lt.u32.totalorder %s3139_s7, %s3923_s17 }
 0x5ca   : > { %p3141_p5 = pnand %p3140_p1, %p3411_p6 }
 0x5cb   : > { %p3146_p4 = por %p3145_p2, %p3144_p0 }
 0x5cc   : > { %p3142_p9 = pneg %p3141_p5 }
 0x5cd   : > { %p3148_p8 = por %p3147_p10, %p3146_p4 }
 0x5cf   : > { %p3149_p13 = pnand %p3148_p8, %p3142_p9 }
 0x5d1   : > { %3152 = shalt.err (!%p3149_p13)
}
 0x5d2   : > { %s3239_s11 = smov 256   ;;  %s3240_s13 = smov 16  }
 0x5d3   : > { %2686 = dma.vmem_to_hbm [thread:$0]  (%p3411_p6), %s3926_s27, 4096, %s3923_s17, %s2236_s26, %s3239_s11, %s3239_s11, %s3240_s13  }
 0x5d4 PF: > { %s4009_s8 = sld [smem:[#allocation14_spill]]  ;;  %s4010_s9 = sld [smem:[#allocation15_spill]] }
 0x5d5   : > { %p2708_p3 = scmp.ge.s32.totalorder %s3227_s25, 2 }
 0x5da   : > { %s2264_s29 = sand.u32 1, %s4009_s8   ;;  %p4011_p7 = scmp.ne.s32.totalorder %s4010_s9, 0 }
 0x5db   : > { %s2265_s16 = scalar_lea.sflag [#allocation6], %s2264_s29 }
 0x5dc   : > { %p2700_p12 = pnand %p2708_p3, %p4011_p7 }
 0x5de   : > { %3194 = dma.done.wait (!%p2700_p12), %s2265_s16, 4096  }
 0x5df   : > { %3196 = vsyncadd (!%p2700_p12), %s2265_s16, 4294963200  ;;  %s22_s25 = sadd.s32 1, %s3227_s25   ;;  %s4012_s18 = smov %s3203_s19 }
 0x5e0   : > { %p19_p11 = scmp.ge.s32.totalorder %s22_s25, 6   ;;  %s4013_s19 = smov %s3207_s20 }
 0x5e1   : > { %s4014_s20 = smov %s3434_s1  ;;  %s4015_s21 = smov %s3219_s23 }
 0x5e2   : > { %s4016_s22 = smov %s3223_s24  ;;  %s4017_s23 = smov %s4020_s14 }
 0x5e3   : > { %s4018_s24 = smov %s4024_s15  ;;  %21 = sbr.rel (!%p19_p11) target bundleno = 10 (0xa), region = 105 }
 0x5ea   :  { %2270 = vsyncpa [#allocation5], 1 }
 0x5eb   :  { %2272 = vsyncpa [#allocation5 + $0x1], 1 }
 0x5ec   :  { %2273 = vsyncpa [#allocation8], 1 }
 0x5ed   :  { %2274 = vsyncpa [#allocation6], 1 }
 0x5ee   :  { %2276 = vsyncpa [#allocation6 + $0x1], 1 }

</bundles_post_ra>
